<compile_context>
chip_gen: v7x
topology: tpu7x:2x2x1
jax: 0.10.0
libtpu: 0.0.40
codegen_flags: <defaults>
</compile_context>

<pallas_src>
import functools

import jax
import jax.numpy as jnp
from jax.experimental import pallas as pl
from jax.experimental.pallas import tpu as pltpu


# Network dims (PyTorch Net): 784 -> 512 -> 256 -> 128 -> 64 -> 10
DIMS = [784, 512, 256, 128, 64, 10]
D_IN = 784
OUT_PAD = 128    # 10 padded up to 128 (lane-dense, unmasked output stores)


def _round_up(x, m):
    return ((x + m - 1) // m) * m


def _pick_tile_m(batch, max_tile):
    """Static (trace-time) batch-tile choice.

    - tiny demo batches (<=32 rows): one tile, rounded up to 16 rows
      (bf16 (16,128) sublane packing for the intermediate activations).
    - otherwise: pick from {16, 32, ..., max_tile}, trading padded-row waste
      (every padded row runs all five matmuls and is discarded) against the
      ~0.35us per-grid-step overhead (~96 rows of MXU work at these layer
      sizes), and require >= 2 grid steps so both v7x TensorCores get work
      (negligible extra cost on single-TC v5e/v6e).
    """
    bt = _round_up(batch, 16)
    if bt <= 32:
        return bt
    step_rows = 96   # per-grid-step overhead expressed in rows of MXU work
    cands = []
    tm = 16
    while tm <= max_tile:
        cands.append(tm)
        tm *= 2
    best_tm, best_cost = None, None
    for tm in reversed(cands):           # ties -> larger tile (fewer steps)
        steps = -(-batch // tm)
        waste = steps * tm - batch
        cost = waste + step_rows * steps + (1_000_000 if steps < 2 else 0)
        if best_cost is None or cost < best_cost:
            best_tm, best_cost = tm, cost
    return best_tm


def mlp_kernel(x_ref,
               w1_ref, b1_ref,
               w2_ref, b2_ref,
               w3_ref, b3_ref,
               w4_ref, b4_ref,
               w5_ref, b5_ref,
               o_ref):
    # Fully fused 5-layer MLP on one (tm, 784) batch tile.
    # bf16 x bf16 MXU matmuls with f32 accumulation; bias-add + ReLU in f32 on
    # the VPU; activations re-cast to bf16 between layers.  The f32 -> bf16
    # cast of x happens here, in VMEM, so the wrapper never re-materializes x.
    h = x_ref[...].astype(jnp.bfloat16)                              # (tm, 784)
    h = jnp.maximum(
        jnp.dot(h, w1_ref[...], preferred_element_type=jnp.float32) + b1_ref[...],
        0.0).astype(jnp.bfloat16)                                    # (tm, 512)
    h = jnp.maximum(
        jnp.dot(h, w2_ref[...], preferred_element_type=jnp.float32) + b2_ref[...],
        0.0).astype(jnp.bfloat16)                                    # (tm, 256)
    h = jnp.maximum(
        jnp.dot(h, w3_ref[...], preferred_element_type=jnp.float32) + b3_ref[...],
        0.0).astype(jnp.bfloat16)                                    # (tm, 128)
    h = jnp.maximum(
        jnp.dot(h, w4_ref[...], preferred_element_type=jnp.float32) + b4_ref[...],
        0.0).astype(jnp.bfloat16)                                    # (tm, 64)
    o_ref[...] = (                                                   # (tm, 128) f32
        jnp.dot(h, w5_ref[...], preferred_element_type=jnp.float32) + b5_ref[...])


def init_params(key):
    """Deterministic PyTorch-Linear-style init: U(-1/sqrt(fan_in), +1/sqrt(fan_in)).

    Weights stored as (in_features, out_features) so the kernel computes
    x @ W + b (equivalent to torch's x @ W.T + b).  Master copies are f32.
    """
    params = []
    keys = jax.random.split(key, 2 * (len(DIMS) - 1))
    for li, (din, dout) in enumerate(zip(DIMS[:-1], DIMS[1:])):
        bound = 1.0 / (din ** 0.5)
        w = jax.random.uniform(keys[2 * li], (din, dout), jnp.float32, -bound, bound)
        b = jax.random.uniform(keys[2 * li + 1], (1, dout), jnp.float32, -bound, bound)
        params.append((w, b))
    return params


def prepare_params(params):
    """One-time conversion of the f32 master params into kernel-ready form.

    Hoisted out of net_forward (per review) so per-call work is just the Pallas
    kernel: weights -> bf16 (MXU-native), layer-5 weight/bias padded 10 -> 128
    output columns for lane-dense stores.  Biases stay f32.
    """
    (w1, b1), (w2, b2), (w3, b3), (w4, b4), (w5, b5) = params
    w5p = jnp.pad(w5.astype(jnp.bfloat16), ((0, 0), (0, OUT_PAD - 10)))
    b5p = jnp.pad(b5, ((0, 0), (0, OUT_PAD - 10)))
    return (w1.astype(jnp.bfloat16), b1,
            w2.astype(jnp.bfloat16), b2,
            w3.astype(jnp.bfloat16), b3,
            w4.astype(jnp.bfloat16), b4,
            w5p, b5p)


@functools.partial(jax.jit, static_argnames=("tile_m",))
def net_forward(x, prepped, tile_m=512):
    w1, b1, w2, b2, w3, b3, w4, b4, w5, b5 = prepped
    x2 = x.reshape(-1, D_IN)          # x.view(-1, 784): layout no-op, stays f32
    b = x2.shape[0]
    tm = _pick_tile_m(b, tile_m)
    grid = (pl.cdiv(b, tm),)          # ceil-div; Pallas masks the ragged tile

    def rep(shape):
        # Grid-invariant weight/bias blocks: DMA'd once, resident across steps.
        return pl.BlockSpec(shape, lambda i: (0, 0))

    out = pl.pallas_call(
        mlp_kernel,
        out_shape=jax.ShapeDtypeStruct((b, OUT_PAD), jnp.float32),
        grid_spec=pltpu.PrefetchScalarGridSpec(
            num_scalar_prefetch=0,
            grid=grid,
            in_specs=[
                pl.BlockSpec((tm, D_IN), lambda i: (i, 0)),   # 784 == full dim
                rep((D_IN, 512)),  rep((1, 512)),
                rep((512, 256)),   rep((1, 256)),
                rep((256, 128)),   rep((1, 128)),
                rep((128, 64)),    rep((1, 64)),
                rep((64, OUT_PAD)), rep((1, OUT_PAD)),
            ],
            out_specs=pl.BlockSpec((tm, OUT_PAD), lambda i: (i, 0)),
        ),
        compiler_params=pltpu.CompilerParams(
            dimension_semantics=("parallel",)),
    )(x2, w1, b1, w2, b2, w3, b3, w4, b4, w5, b5)
    return out[:, :10]


def net_forward_ref_f32(x, params):
    # Pure f32 reference (exact PyTorch-module semantics).
    h = x.reshape(-1, D_IN).astype(jnp.float32)
    for i, (w, bb) in enumerate(params):
        h = h @ w + bb
        if i < len(params) - 1:
            h = jnp.maximum(h, 0.0)
    return h


def net_forward_ref_bf16(x, params):
    # Reference matching the kernel's numerics: bf16 inputs/weights, f32 accum.
    h = x.reshape(-1, D_IN).astype(jnp.bfloat16)
    for i, (w, bb) in enumerate(params):
        h = jnp.dot(h, w.astype(jnp.bfloat16),
                    preferred_element_type=jnp.float32) + bb
        if i < len(params) - 1:
            h = jnp.maximum(h, 0.0).astype(jnp.bfloat16)
    return h


if __name__ == "__main__":
    key = jax.random.PRNGKey(0)
    pkey, xkey, xkey2 = jax.random.split(key, 3)
    params = init_params(pkey)
    prepped = prepare_params(params)     # one-time kernel-ready param prep

    # Small MNIST-like NCHW input: batch=2, channels=1, 28x28 -> view(-1, 784).
    x = jax.random.normal(xkey, (2, 1, 28, 28), dtype=jnp.float32)
    y = jax.block_until_ready(net_forward(x, prepped))
    assert y.shape == (2, 10)
    # NOTE: bf16 weights/activations with f32 accumulation is an intentional
    # numerics contract (MXU-native); the pure-f32 reference only matches at
    # a looser tolerance.
    assert jnp.allclose(y, net_forward_ref_bf16(x, params), atol=1e-2, rtol=1e-2)
    assert jnp.allclose(y, net_forward_ref_f32(x, params), atol=1e-1, rtol=1e-1)

    # Larger, ragged batch to exercise the multi-step grid + masked last tile.
    xl = jax.random.normal(xkey2, (300, 1, 28, 28), dtype=jnp.float32)
    yl = jax.block_until_ready(net_forward(xl, prepped))
    assert yl.shape == (300, 10)
    assert jnp.allclose(yl, net_forward_ref_bf16(xl, params), atol=1e-2, rtol=1e-2)

    print("KERNEL_OK")
</pallas_src>

<mosaic_0001>
module attributes {stable_mosaic.version = 11 : i64} {
  func.func @mlp_kernel(%arg0: i32, %arg1: memref<16x784xf32, #tpu.memory_space<vmem>>, %arg2: memref<784x512xbf16, #tpu.memory_space<vmem>>, %arg3: memref<1x512xf32, #tpu.memory_space<vmem>>, %arg4: memref<512x256xbf16, #tpu.memory_space<vmem>>, %arg5: memref<1x256xf32, #tpu.memory_space<vmem>>, %arg6: memref<256x128xbf16, #tpu.memory_space<vmem>>, %arg7: memref<1x128xf32, #tpu.memory_space<vmem>>, %arg8: memref<128x64xbf16, #tpu.memory_space<vmem>>, %arg9: memref<1x64xf32, #tpu.memory_space<vmem>>, %arg10: memref<64x128xbf16, #tpu.memory_space<vmem>>, %arg11: memref<1x128xf32, #tpu.memory_space<vmem>>, %arg12: memref<16x128xf32, #tpu.memory_space<vmem>>) attributes {dimension_semantics = [#tpu.dimension_semantics<parallel>], iteration_bounds = array<i64: 1>, scalar_prefetch = 0 : i64, scratch_operands = 0 : i64, tpu.core_type = #tpu.core_type<tc>, window_params = [{transform_indices = @transform_0, window_bounds = array<i64: 16, 784>}, {pipeline_mode = #tpu.pipeline_mode<synchronous>, transform_indices = @transform_1, window_bounds = array<i64: 784, 512>}, {pipeline_mode = #tpu.pipeline_mode<synchronous>, transform_indices = @transform_2, window_bounds = array<i64: 1, 512>}, {pipeline_mode = #tpu.pipeline_mode<synchronous>, transform_indices = @transform_3, window_bounds = array<i64: 512, 256>}, {pipeline_mode = #tpu.pipeline_mode<synchronous>, transform_indices = @transform_4, window_bounds = array<i64: 1, 256>}, {pipeline_mode = #tpu.pipeline_mode<synchronous>, transform_indices = @transform_5, window_bounds = array<i64: 256, 128>}, {pipeline_mode = #tpu.pipeline_mode<synchronous>, transform_indices = @transform_6, window_bounds = array<i64: 1, 128>}, {pipeline_mode = #tpu.pipeline_mode<synchronous>, transform_indices = @transform_7, window_bounds = array<i64: 128, 64>}, {pipeline_mode = #tpu.pipeline_mode<synchronous>, transform_indices = @transform_8, window_bounds = array<i64: 1, 64>}, {pipeline_mode = #tpu.pipeline_mode<synchronous>, transform_indices = @transform_9, window_bounds = array<i64: 64, 128>}, {pipeline_mode = #tpu.pipeline_mode<synchronous>, transform_indices = @transform_10, window_bounds = array<i64: 1, 128>}, {transform_indices = @transform_11, window_bounds = array<i64: 16, 128>}]} {
    %c0 = arith.constant 0 : index
    %c0_0 = arith.constant 0 : index
    %0 = vector.load %arg1[%c0, %c0_0] : memref<16x784xf32, #tpu.memory_space<vmem>>, vector<16x784xf32>
    %1 = arith.truncf %0 : vector<16x784xf32> to vector<16x784xbf16>
    %c0_1 = arith.constant 0 : index
    %c0_2 = arith.constant 0 : index
    %2 = vector.load %arg2[%c0_1, %c0_2] : memref<784x512xbf16, #tpu.memory_space<vmem>>, vector<784x512xbf16>
    %cst = arith.constant dense<0.000000e+00> : vector<16x512xf32>
    %3 = tpu.matmul %1, %2, %cst {dimension_numbers = #tpu.dot_dimension_numbers<[1], [0], [0], [1], [0, 0, 1, 1], [], []>} : vector<16x784xbf16>, vector<784x512xbf16>, vector<16x512xf32> -> vector<16x512xf32>
    %c0_3 = arith.constant 0 : index
    %c0_4 = arith.constant 0 : index
    %4 = vector.load %arg3[%c0_3, %c0_4] : memref<1x512xf32, #tpu.memory_space<vmem>>, vector<1x512xf32>
    %5 = vector.broadcast %4 : vector<1x512xf32> to vector<16x512xf32>
    %6 = arith.addf %3, %5 : vector<16x512xf32>
    %cst_5 = arith.constant 0.000000e+00 : f32
    %7 = vector.broadcast %cst_5 : f32 to vector<16x512xf32>
    %8 = arith.maximumf %6, %7 : vector<16x512xf32>
    %9 = arith.truncf %8 : vector<16x512xf32> to vector<16x512xbf16>
    %c0_6 = arith.constant 0 : index
    %c0_7 = arith.constant 0 : index
    %10 = vector.load %arg4[%c0_6, %c0_7] : memref<512x256xbf16, #tpu.memory_space<vmem>>, vector<512x256xbf16>
    %cst_8 = arith.constant dense<0.000000e+00> : vector<16x256xf32>
    %11 = tpu.matmul %9, %10, %cst_8 {dimension_numbers = #tpu.dot_dimension_numbers<[1], [0], [0], [1], [0, 0, 1, 1], [], []>} : vector<16x512xbf16>, vector<512x256xbf16>, vector<16x256xf32> -> vector<16x256xf32>
    %c0_9 = arith.constant 0 : index
    %c0_10 = arith.constant 0 : index
    %12 = vector.load %arg5[%c0_9, %c0_10] : memref<1x256xf32, #tpu.memory_space<vmem>>, vector<1x256xf32>
    %13 = vector.broadcast %12 : vector<1x256xf32> to vector<16x256xf32>
    %14 = arith.addf %11, %13 : vector<16x256xf32>
    %cst_11 = arith.constant 0.000000e+00 : f32
    %15 = vector.broadcast %cst_11 : f32 to vector<16x256xf32>
    %16 = arith.maximumf %14, %15 : vector<16x256xf32>
    %17 = arith.truncf %16 : vector<16x256xf32> to vector<16x256xbf16>
    %c0_12 = arith.constant 0 : index
    %c0_13 = arith.constant 0 : index
    %18 = vector.load %arg6[%c0_12, %c0_13] : memref<256x128xbf16, #tpu.memory_space<vmem>>, vector<256x128xbf16>
    %cst_14 = arith.constant dense<0.000000e+00> : vector<16x128xf32>
    %19 = tpu.matmul %17, %18, %cst_14 {dimension_numbers = #tpu.dot_dimension_numbers<[1], [0], [0], [1], [0, 0, 1, 1], [], []>} : vector<16x256xbf16>, vector<256x128xbf16>, vector<16x128xf32> -> vector<16x128xf32>
    %c0_15 = arith.constant 0 : index
    %c0_16 = arith.constant 0 : index
    %20 = vector.load %arg7[%c0_15, %c0_16] : memref<1x128xf32, #tpu.memory_space<vmem>>, vector<1x128xf32>
    %21 = vector.broadcast %20 : vector<1x128xf32> to vector<16x128xf32>
    %22 = arith.addf %19, %21 : vector<16x128xf32>
    %cst_17 = arith.constant 0.000000e+00 : f32
    %23 = vector.broadcast %cst_17 : f32 to vector<16x128xf32>
    %24 = arith.maximumf %22, %23 : vector<16x128xf32>
    %25 = arith.truncf %24 : vector<16x128xf32> to vector<16x128xbf16>
    %c0_18 = arith.constant 0 : index
    %c0_19 = arith.constant 0 : index
    %26 = vector.load %arg8[%c0_18, %c0_19] : memref<128x64xbf16, #tpu.memory_space<vmem>>, vector<128x64xbf16>
    %cst_20 = arith.constant dense<0.000000e+00> : vector<16x64xf32>
    %27 = tpu.matmul %25, %26, %cst_20 {dimension_numbers = #tpu.dot_dimension_numbers<[1], [0], [0], [1], [0, 0, 1, 1], [], []>} : vector<16x128xbf16>, vector<128x64xbf16>, vector<16x64xf32> -> vector<16x64xf32>
    %c0_21 = arith.constant 0 : index
    %c0_22 = arith.constant 0 : index
    %28 = vector.load %arg9[%c0_21, %c0_22] : memref<1x64xf32, #tpu.memory_space<vmem>>, vector<1x64xf32>
    %29 = vector.broadcast %28 : vector<1x64xf32> to vector<16x64xf32>
    %30 = arith.addf %27, %29 : vector<16x64xf32>
    %cst_23 = arith.constant 0.000000e+00 : f32
    %31 = vector.broadcast %cst_23 : f32 to vector<16x64xf32>
    %32 = arith.maximumf %30, %31 : vector<16x64xf32>
    %33 = arith.truncf %32 : vector<16x64xf32> to vector<16x64xbf16>
    %c0_24 = arith.constant 0 : index
    %c0_25 = arith.constant 0 : index
    %34 = vector.load %arg10[%c0_24, %c0_25] : memref<64x128xbf16, #tpu.memory_space<vmem>>, vector<64x128xbf16>
    %cst_26 = arith.constant dense<0.000000e+00> : vector<16x128xf32>
    %35 = tpu.matmul %33, %34, %cst_26 {dimension_numbers = #tpu.dot_dimension_numbers<[1], [0], [0], [1], [0, 0, 1, 1], [], []>} : vector<16x64xbf16>, vector<64x128xbf16>, vector<16x128xf32> -> vector<16x128xf32>
    %c0_27 = arith.constant 0 : index
    %c0_28 = arith.constant 0 : index
    %36 = vector.load %arg11[%c0_27, %c0_28] : memref<1x128xf32, #tpu.memory_space<vmem>>, vector<1x128xf32>
    %37 = vector.broadcast %36 : vector<1x128xf32> to vector<16x128xf32>
    %38 = arith.addf %35, %37 : vector<16x128xf32>
    %c0_29 = arith.constant 0 : index
    %c0_30 = arith.constant 0 : index
    %39 = vector.load %arg12[%c0_29, %c0_30] : memref<16x128xf32, #tpu.memory_space<vmem>>, vector<16x128xf32>
    tpu.vector_store %arg12[%c0_29, %c0_30], %38 {strides = array<i32>} : memref<16x128xf32, #tpu.memory_space<vmem>>, vector<16x128xf32>,
    return
  }
  func.func @transform_0(%arg0: i32) -> (i32, i32) {
    %c0_i32 = arith.constant 0 : i32
    %c0_i32_0 = arith.constant 0 : i32
    return %arg0, %c0_i32 : i32, i32
  }
  func.func @transform_1(%arg0: i32) -> (i32, i32) {
    %c0_i32 = arith.constant 0 : i32
    %c0_i32_0 = arith.constant 0 : i32
    %c0_i32_1 = arith.constant 0 : i32
    return %c0_i32, %c0_i32_0 : i32, i32
  }
  func.func @transform_2(%arg0: i32) -> (i32, i32) {
    %c0_i32 = arith.constant 0 : i32
    %c0_i32_0 = arith.constant 0 : i32
    %c0_i32_1 = arith.constant 0 : i32
    return %c0_i32, %c0_i32_0 : i32, i32
  }
  func.func @transform_3(%arg0: i32) -> (i32, i32) {
    %c0_i32 = arith.constant 0 : i32
    %c0_i32_0 = arith.constant 0 : i32
    %c0_i32_1 = arith.constant 0 : i32
    return %c0_i32, %c0_i32_0 : i32, i32
  }
  func.func @transform_4(%arg0: i32) -> (i32, i32) {
    %c0_i32 = arith.constant 0 : i32
    %c0_i32_0 = arith.constant 0 : i32
    %c0_i32_1 = arith.constant 0 : i32
    return %c0_i32, %c0_i32_0 : i32, i32
  }
  func.func @transform_5(%arg0: i32) -> (i32, i32) {
    %c0_i32 = arith.constant 0 : i32
    %c0_i32_0 = arith.constant 0 : i32
    %c0_i32_1 = arith.constant 0 : i32
    return %c0_i32, %c0_i32_0 : i32, i32
  }
  func.func @transform_6(%arg0: i32) -> (i32, i32) {
    %c0_i32 = arith.constant 0 : i32
    %c0_i32_0 = arith.constant 0 : i32
    %c0_i32_1 = arith.constant 0 : i32
    return %c0_i32, %c0_i32_0 : i32, i32
  }
  func.func @transform_7(%arg0: i32) -> (i32, i32) {
    %c0_i32 = arith.constant 0 : i32
    %c0_i32_0 = arith.constant 0 : i32
    %c0_i32_1 = arith.constant 0 : i32
    return %c0_i32, %c0_i32_0 : i32, i32
  }
  func.func @transform_8(%arg0: i32) -> (i32, i32) {
    %c0_i32 = arith.constant 0 : i32
    %c0_i32_0 = arith.constant 0 : i32
    %c0_i32_1 = arith.constant 0 : i32
    return %c0_i32, %c0_i32_0 : i32, i32
  }
  func.func @transform_9(%arg0: i32) -> (i32, i32) {
    %c0_i32 = arith.constant 0 : i32
    %c0_i32_0 = arith.constant 0 : i32
    %c0_i32_1 = arith.constant 0 : i32
    return %c0_i32, %c0_i32_0 : i32, i32
  }
  func.func @transform_10(%arg0: i32) -> (i32, i32) {
    %c0_i32 = arith.constant 0 : i32
    %c0_i32_0 = arith.constant 0 : i32
    %c0_i32_1 = arith.constant 0 : i32
    return %c0_i32, %c0_i32_0 : i32, i32
  }
  func.func @transform_11(%arg0: i32) -> (i32, i32) {
    %c0_i32 = arith.constant 0 : i32
    %c0_i32_0 = arith.constant 0 : i32
    return %arg0, %c0_i32 : i32, i32
  }
}

</mosaic_0001>

<bundles_post_ra>
// kernel: net_forward.1
= control target key start
LH: loop header
LB: loop body
LE: loop exit
PB: predicated region body
PF: predicated region fallthrough
CT: control target
= control target key end

     0   :  { %16 = vsyncpa [#allocation3], 0  ;;  %s3981_s0 = inlined_call_operand.vmem [shape: f32[2,784], index: 0, kind: input, shape index: {}]   ;;  %s3982_s1 = inlined_call_operand.hbm [shape: bf16[784,512], index: 1, kind: input, shape index: {}]   ;;  %s3983_s2 = inlined_call_operand.vmem [shape: f32[1,512], index: 2, kind: input, shape index: {}]   ;;  %s3984_s3 = inlined_call_operand.hbm [shape: bf16[512,256], index: 3, kind: input, shape index: {}]   ;;  %s3985_s4 = inlined_call_operand.vmem [shape: f32[1,256], index: 4, kind: input, shape index: {}]   ;;  %s3986_s5 = inlined_call_operand.vmem [shape: bf16[256,128], index: 5, kind: input, shape index: {}]   ;;  %s3987_s6 = inlined_call_operand.vmem [shape: f32[1,128], index: 6, kind: input, shape index: {}]   ;;  %s3988_s7 = inlined_call_operand.vmem [shape: bf16[128,64], index: 7, kind: input, shape index: {}]   ;;  %s3989_s8 = inlined_call_operand.vmem [shape: f32[1,64], index: 8, kind: input, shape index: {}]   ;;  %s3990_s9 = inlined_call_operand.vmem [shape: bf16[64,128], index: 9, kind: input, shape index: {}]   ;;  %s3991_s10 = inlined_call_operand.vmem [shape: f32[1,128], index: 10, kind: input, shape index: {}]   ;;  %s3992_s11 = inlined_call_operand.hbm [shape: f32[2,128], index: 11, kind: output, shape index: {}]  }
   0x1   :  { %17 = vsyncpa [#allocation6], 0 }
   0x2   :  { %18 = vsyncpa [#allocation4], 0  ;;  %s3636_s17 = smov [#allocation2]   ;;  %s3564_s21 = scalar_lea.hbm %s3982_s1, 25088 }
   0x3   :  { %s26_s18 = sshll.u32 %s3636_s17, 4  ;;  %p3565_p0 = scmp.ne.s32.totalorder %s3982_s1, %s3564_s21  ;;  %s27_s18 = int_to_ptr.vmem [resolvable:$true] %s26_s18 }
   0x4   :  { %p3568_p1 = scmp.lt.u32.totalorder %s3564_s21, %s3982_s1 }
   0x6   :  { %p3570_p2 = pnand %p3568_p1, %p3565_p0 }
   0x8   :  { %3573 = shalt.err (!%p3570_p2)
}
   0x9   :  { %s3574_s26 = scalar_lea.vmem %s27_s18, 25088  ;;  %p3579_p4 = scmp.lt.s32.totalorder %s27_s18, %s27_s18 }
   0xa   :  { %p3575_p3 = scmp.ne.s32.totalorder %s27_s18, %s3574_s26  ;;  %p3580_p5 = scmp.lt.s32.totalorder %s3574_s26, %s3574_s26 }
   0xc   :  { %p3581_p6 = por %p3580_p5, %p3579_p4 }
   0xe   :  { %p3582_p7 = pnand %p3581_p6, %p3575_p3 }
  0x10   :  { %3585 = shalt.err (!%p3582_p7)
}
  0x11   :  { %s3637_s27 = smov 256   ;;  %s3638_s28 = smov 16  }
  0x12   :  { %32 = dma.hbm_to_vmem [thread:$0]  %s3982_s1, 25088, %s27_s18, [#allocation3], %s3637_s27, %s3637_s27, %s3638_s28  }
  0x13   :  { %s3639_s12 = smov [#allocation5]   ;;  %s3586_s16 = scalar_lea.hbm %s3984_s3, 8192 }
  0x14   :  { %s40_s13 = sshll.u32 %s3639_s12, 4  ;;  %p3587_p8 = scmp.ne.s32.totalorder %s3984_s3, %s3586_s16  ;;  %s41_s13 = int_to_ptr.vmem [resolvable:$true] %s40_s13 }
  0x15   :  { %p3590_p9 = scmp.lt.u32.totalorder %s3586_s16, %s3984_s3 }
  0x17   :  { %p3592_p10 = pnand %p3590_p9, %p3587_p8 }
  0x19   :  { %3595 = shalt.err (!%p3592_p10)
}
  0x1a   :  { %s3596_s22 = scalar_lea.vmem %s41_s13, 8192  ;;  %p3601_p12 = scmp.lt.s32.totalorder %s41_s13, %s41_s13 }
  0x1b   :  { %p3597_p11 = scmp.ne.s32.totalorder %s41_s13, %s3596_s22  ;;  %p3602_p13 = scmp.lt.s32.totalorder %s3596_s22, %s3596_s22 }
  0x1d   :  { %p3603_p0 = por %p3602_p13, %p3601_p12 }
  0x1f   :  { %p3604_p1 = pnand %p3603_p0, %p3597_p11 }
  0x21   :  { %3607 = shalt.err (!%p3604_p1)
}
  0x22   :  { %s3640_s1 = smov 128   ;;  %s3641_s18 = smov 8  }
  0x23   :  { %46 = dma.hbm_to_vmem [thread:$0]  %s3984_s3, 8192, %s41_s13, [#allocation6], %s3640_s1, %s3640_s1, %s3641_s18  }
  0x24   :  { %3630 = dma.done.wait [#allocation3], 25088  }
  0x25   :  { %3631 = vsyncadd [#allocation3], 4294942208 }
  0x26   :  { %3632 = dma.done.wait [#allocation6], 8192  }
  0x27   :  { %3633 = vsyncadd [#allocation6], 4294959104  ;;  %v3642_v0 = vmov 0   ;;  %v3643_v1 = vmov 1983009808   ;;  %v107_v3 = vlaneseq  ;;  %vm1461_vm0 = vcmask 130048  }
  0x28   :  { %1626 = vmatprep.mubr.bf16.mxu1 %v3642_v0  ;;  %v105_v2 = vunpack.c.l.s4 %v3643_v1  ;;  %v3122_v4 = vld [vmem:[#allocation2 + $0x4] ss:$16 sps:$4 sm:$0xff]   ;;  %v3124_v5 = vld [vmem:[#allocation2] ss:$16 sps:$4 sm:$0xff]   ;;  %v3133_v12 = vld [vmem:[#allocation2 + $0xc] ss:$16 sps:$4 sm:$0xff]  }
  0x29   :  { %1465 = vmatprep.subr.bf16.mxu0 %v3122_v4  ;;  %v3125_v6 = vld [vmem:[#allocation2 + $0x604] ss:$16 sps:$4 sm:$0xff]   ;;  %v3127_v7 = vld [vmem:[#allocation2 + $0x600] ss:$16 sps:$4 sm:$0xff]   ;;  %v3734_v9 = vshrl.u32 %v107_v3, 7  ;;  %vm3645_vm1 = vmmov 0  }
  0x2a   :  { %v106_v8 = vunpack.c.0.s8 %v105_v2  ;;  %1466 = vmatpush1.bf16.msra.mxu0 %v3124_v5  ;;  %v3128_v10 = vld [vmem:[#allocation2 + $0x24] ss:$16 sps:$4 sm:$0xff]   ;;  %v3130_v11 = vld [vmem:[#allocation2 + $0x20] ss:$16 sps:$4 sm:$0xff]   ;;  %1594 = vmatprep.subr.bf16.mxu1 %v3125_v6  ;;  %v3131_v28 = vld [vmem:[#allocation2 + $0x8] ss:$16 sps:$4 sm:$0xff]  }
  0x2b   :  { %1595 = vmatpush1.bf16.msra.mxu1 %v3127_v7  ;;  %1467 = vmatprep.subr.bf16.mxu0 %v3128_v10  ;;  %v3134_v14 = vld [vmem:[%s3981_s0 + $0xc] ss:$14 sps:$4 sm:$0x33]   ;;  %v3136_v15 = vld [vmem:[%s3981_s0 + $0x28] ss:$14 sps:$4 sm:$0x33]  }
  0x2c   :  { %v3737_v13 = vsub.s32 %v106_v8, %v3734_v9  ;;  %1637 = vmatprep.subr.bf16.mxu1 %v3133_v12  ;;  %v3138_v16 = vld [vmem:[%s3981_s0 + $0x44] ss:$14 sps:$4 sm:$0x33]   ;;  %v3140_v17 = vld [vmem:[%s3981_s0 + $0x60] ss:$14 sps:$4 sm:$0x33]  }
  0x2d   :  { %v3142_v20 = vld [vmem:[#allocation2 + $0x44] ss:$16 sps:$4 sm:$0xff]   ;;  %v3144_v23 = vld [vmem:[#allocation2 + $0x40] ss:$16 sps:$4 sm:$0xff]   ;;  %v3147_v30 = vld [vmem:[#allocation2 + $0x2c] ss:$16 sps:$4 sm:$0xff]  }
  0x2e   :  { %1468 = vmatpush1.bf16.msra.mxu0 %v3130_v11  ;;  %v153_v18 = vrot.slane %v3134_v14, %v3737_v13  ;;  %v167_v19 = vrot.slane %v3136_v15, %v3737_v13  ;;  %v224_v21 = vrot.slane %v3138_v16, %v3737_v13  ;;  %v238_v22 = vrot.slane %v3140_v17, %v3737_v13  ;;  %v3148_v26 = vld [vmem:[#allocation2 + $0x64] ss:$16 sps:$4 sm:$0xff]   ;;  %v3150_v27 = vld [vmem:[#allocation2 + $0x60] ss:$16 sps:$4 sm:$0xff]   ;;  %v3145_v32 = vld [vmem:[#allocation2 + $0x28] ss:$16 sps:$4 sm:$0xff]  }
  0x2f   :  { %1469 = vmatprep.subr.bf16.mxu0 %v3142_v20  ;;  %v3154_v31 = vld [vmem:[#allocation2 + $0x84] ss:$16 sps:$4 sm:$0xff]   ;;  %v3156_v33 = vld [vmem:[#allocation2 + $0x80] ss:$16 sps:$4 sm:$0xff]   ;;  %v3153_v35 = vld [vmem:[#allocation2 + $0x4c] ss:$16 sps:$4 sm:$0xff]  }
  0x30   :  { %v170_v24 = vcombine.low %v153_v18, %v167_v19  ;;  %v241_v25 = vcombine.low %v224_v21, %v238_v22  ;;  %v3160_v34 = vld [vmem:[#allocation2 + $0xa4] ss:$16 sps:$4 sm:$0xff]   ;;  %v3151_v36 = vld [vmem:[#allocation2 + $0x48] ss:$16 sps:$4 sm:$0xff]   ;;  %v3162_v37 = vld [vmem:[#allocation2 + $0xa0] ss:$16 sps:$4 sm:$0xff]  }
  0x31   :  { %v3166_v38 = vld [vmem:[#allocation2 + $0xc4] ss:$16 sps:$4 sm:$0xff]   ;;  %v3159_v39 = vld [vmem:[#allocation2 + $0x6c] ss:$16 sps:$4 sm:$0xff]   ;;  %v3157_v40 = vld [vmem:[#allocation2 + $0x68] ss:$16 sps:$4 sm:$0xff]  }
  0x32   :  { %1470 = vmatpush1.bf16.msra.mxu0 %v3144_v23  ;;  %v3755_v29 = vpack.c.bf16 %v241_v25, %v170_v24  ;;  %v3168_v41 = vld [vmem:[#allocation2 + $0xc0] ss:$16 sps:$4 sm:$0xff]   ;;  %v3172_v42 = vld [vmem:[#allocation2 + $0xe4] ss:$16 sps:$4 sm:$0xff]   ;;  %v3165_v43 = vld [vmem:[#allocation2 + $0x8c] ss:$16 sps:$4 sm:$0xff]  }
  0x33   :  { %1471 = vmatprep.subr.bf16.mxu0 %v3148_v26  ;;  %v3163_v44 = vld [vmem:[#allocation2 + $0x88] ss:$16 sps:$4 sm:$0xff]   ;;  %v3174_v45 = vld [vmem:[#allocation2 + $0xe0] ss:$16 sps:$4 sm:$0xff]   ;;  %v3178_v46 = vld [vmem:[#allocation2 + $0x104] ss:$16 sps:$4 sm:$0xff]  }
  0x34   :  { %2903 = vmatmul.mubr.msk.bf16.vlgmr.msra.gmra.mrb[0].mxu1 %vm1461_vm0, %v3755_v29  ;;  %v3171_v47 = vld [vmem:[#allocation2 + $0xac] ss:$16 sps:$4 sm:$0xff]   ;;  %v3169_v48 = vld [vmem:[#allocation2 + $0xa8] ss:$16 sps:$4 sm:$0xff]   ;;  %v3180_v49 = vld [vmem:[#allocation2 + $0x100] ss:$16 sps:$4 sm:$0xff]  }
  0x35   :  { %1638 = vmatpush1.bf16.msra.mxu1 %v3131_v28  ;;  %v3184_v50 = vld [vmem:[#allocation2 + $0x124] ss:$16 sps:$4 sm:$0xff]   ;;  %v3177_v51 = vld [vmem:[#allocation2 + $0xcc] ss:$16 sps:$4 sm:$0xff]   ;;  %v3175_v52 = vld [vmem:[#allocation2 + $0xc8] ss:$16 sps:$4 sm:$0xff]  }
  0x36   :  { %1472 = vmatpush1.bf16.msra.mxu0 %v3150_v27  ;;  %1639 = vmatprep.subr.bf16.mxu1 %v3147_v30  ;;  %v3186_v53 = vld [vmem:[#allocation2 + $0x120] ss:$16 sps:$4 sm:$0xff]   ;;  %v3190_v54 = vld [vmem:[#allocation2 + $0x144] ss:$16 sps:$4 sm:$0xff]   ;;  %v3183_v55 = vld [vmem:[#allocation2 + $0xec] ss:$16 sps:$4 sm:$0xff]  }
  0x37   :  { %1473 = vmatprep.subr.bf16.mxu0 %v3154_v31  ;;  %v3181_v56 = vld [vmem:[#allocation2 + $0xe8] ss:$16 sps:$4 sm:$0xff]   ;;  %v3192_v57 = vld [vmem:[#allocation2 + $0x140] ss:$16 sps:$4 sm:$0xff]   ;;  %v3196_v58 = vld [vmem:[#allocation2 + $0x164] ss:$16 sps:$4 sm:$0xff]  }
  0x38   :  { %v3189_v59 = vld [vmem:[#allocation2 + $0x10c] ss:$16 sps:$4 sm:$0xff]   ;;  %v3187_v60 = vld [vmem:[#allocation2 + $0x108] ss:$16 sps:$4 sm:$0xff]   ;;  %v3198_v62 = vld [vmem:[#allocation2 + $0x160] ss:$16 sps:$4 sm:$0xff]  }
  0x39   :  { %1640 = vmatpush1.bf16.msra.mxu1 %v3145_v32  ;;  %v3195_v61 = vld [vmem:[#allocation2 + $0x12c] ss:$16 sps:$4 sm:$0xff]   ;;  %v3202_v63 = vld [vmem:[#allocation2 + $0x184] ss:$16 sps:$4 sm:$0xff]   ;;  %v3204_v1 = vld [vmem:[#allocation2 + $0x180] ss:$16 sps:$4 sm:$0xff]  }
  0x3a   :  { %1474 = vmatpush1.bf16.msra.mxu0 %v3156_v33  ;;  %1641 = vmatprep.subr.bf16.mxu1 %v3153_v35  ;;  %v3193_v2 = vld [vmem:[#allocation2 + $0x128] ss:$16 sps:$4 sm:$0xff]   ;;  %v3208_v3 = vld [vmem:[#allocation2 + $0x1a4] ss:$16 sps:$4 sm:$0xff]   ;;  %v3201_v4 = vld [vmem:[#allocation2 + $0x14c] ss:$16 sps:$4 sm:$0xff]  }
  0x3b   :  { %1475 = vmatprep.subr.bf16.mxu0 %v3160_v34  ;;  %v3226_v5 = vld [vmem:[%s3981_s0] ss:$14 sps:$4 sm:$0xff]   ;;  %v3228_v6 = vld [vmem:[%s3981_s0 + $0x4] ss:$14 sps:$4 sm:$0xff]   ;;  %v3229_v7 = vld [vmem:[%s3981_s0 + $0x1c] ss:$14 sps:$4 sm:$0xff]  }
  0x3c   :  { %v3231_v8 = vld [vmem:[%s3981_s0 + $0x20] ss:$14 sps:$4 sm:$0xff]   ;;  %v3232_v10 = vld [vmem:[%s3981_s0 + $0x38] ss:$14 sps:$4 sm:$0xff]   ;;  %v3234_v11 = vld [vmem:[%s3981_s0 + $0x3c] ss:$14 sps:$4 sm:$0xff]   ;;  %v110_v12 = vrot.slane %v3226_v5, %v3737_v13  ;;  %v124_v14 = vrot.slane %v3229_v7, %v3737_v13  ;;  %v117_v17 = vrot.slane %v3228_v6, %v3737_v13 }
  0x3d   :  { %1642 = vmatpush1.bf16.msra.mxu1 %v3151_v36  ;;  %v3235_v15 = vld [vmem:[%s3981_s0 + $0x54] ss:$14 sps:$4 sm:$0xff]   ;;  %v3237_v16 = vld [vmem:[%s3981_s0 + $0x58] ss:$14 sps:$4 sm:$0xff]   ;;  %v181_v20 = vrot.slane %v3232_v10, %v3737_v13  ;;  %v131_v21 = vrot.slane %v3231_v8, %v3737_v13  ;;  %v188_v22 = vrot.slane %v3234_v11, %v3737_v13  ;;  %v3207_v26 = vld [vmem:[#allocation2 + $0x16c] ss:$16 sps:$4 sm:$0xff]  }
  0x3e   :  { %1476 = vmatpush1.bf16.msra.mxu0 %v3162_v37  ;;  %1643 = vmatprep.subr.bf16.mxu1 %v3159_v39  ;;  %v3199_v18 = vld [vmem:[#allocation2 + $0x148] ss:$16 sps:$4 sm:$0xff]   ;;  %v3210_v19 = vld [vmem:[#allocation2 + $0x1a0] ss:$16 sps:$4 sm:$0xff]   ;;  %v3214_v23 = vld [vmem:[#allocation2 + $0x1c4] ss:$16 sps:$4 sm:$0xff]   ;;  %v133_v24 = vcombine.high %v110_v12, %v124_v14  ;;  %v195_v25 = vrot.slane %v3235_v15, %v3737_v13  ;;  %v202_v27 = vrot.slane %v3237_v16, %v3737_v13 }
  0x3f   :  { %1477 = vmatprep.subr.bf16.mxu0 %v3166_v38  ;;  %v134_v28 = vcombine.low %v117_v17, %v131_v21  ;;  %v3205_v31 = vld [vmem:[#allocation2 + $0x168] ss:$16 sps:$4 sm:$0xff]   ;;  %v3216_v32 = vld [vmem:[#allocation2 + $0x1c0] ss:$16 sps:$4 sm:$0xff]   ;;  %v3220_v34 = vld [vmem:[#allocation2 + $0x1e4] ss:$16 sps:$4 sm:$0xff]   ;;  %v132_v38 = vcombine.low %v110_v12, %v124_v14 }
  0x40   :  { %v204_v30 = vcombine.high %v181_v20, %v195_v25  ;;  %v205_v33 = vcombine.low %v188_v22, %v202_v27  ;;  %v3213_v36 = vld [vmem:[#allocation2 + $0x18c] ss:$16 sps:$4 sm:$0xff]   ;;  %v203_v39 = vcombine.low %v181_v20, %v195_v25  ;;  %v3259_v5 = vld [vmem:[#allocation2 + $0x248] ss:$16 sps:$4 sm:$0xff]   ;;  %v3268_v6 = vld [vmem:[#allocation2 + $0x2a0] ss:$16 sps:$4 sm:$0xff]  }
  0x41   :  { %1644 = vmatpush1.bf16.msra.mxu1 %v3157_v40  ;;  %v3211_v40 = vld [vmem:[#allocation2 + $0x188] ss:$16 sps:$4 sm:$0xff]   ;;  %v3276_v7 = vld [vmem:[#allocation2 + $0x2c4] ss:$16 sps:$4 sm:$0xff]   ;;  %v3267_v8 = vld [vmem:[#allocation2 + $0x26c] ss:$16 sps:$4 sm:$0xff]  }
  0x42   :  { %1478 = vmatpush1.bf16.msra.mxu0 %v3168_v41  ;;  %1645 = vmatprep.subr.bf16.mxu1 %v3165_v43  ;;  %v257_v35 = vpack.c.bf16 %v204_v30, %v133_v24  ;;  %v3791_v37 = vpack.c.bf16 %v205_v33, %v134_v28  ;;  %v3222_v41 = vld [vmem:[#allocation2 + $0x1e0] ss:$16 sps:$4 sm:$0xff]   ;;  %v206_v43 = vcombine.high %v188_v22, %v202_v27  ;;  %v3265_v10 = vld [vmem:[#allocation2 + $0x268] ss:$16 sps:$4 sm:$0xff]   ;;  %v3282_v12 = vld [vmem:[#allocation2 + $0x2e4] ss:$16 sps:$4 sm:$0xff]  }
  0x43   :  { %1479 = vmatprep.subr.bf16.mxu0 %v3172_v42  ;;  %v135_v42 = vcombine.high %v117_v17, %v131_v21  ;;  %v3274_v11 = vld [vmem:[#allocation2 + $0x2c0] ss:$16 sps:$4 sm:$0xff]   ;;  %v3273_v14 = vld [vmem:[#allocation2 + $0x28c] ss:$16 sps:$4 sm:$0xff]   ;;  %v3271_v15 = vld [vmem:[#allocation2 + $0x288] ss:$16 sps:$4 sm:$0xff]  }
  0x44   :  { %1497 = vmatprep.mubr.bf16.mxu0 %v257_v35  ;;  %1669 = vmatprep.mubr.bf16.mxu1 %v257_v35  ;;  %v3280_v16 = vld [vmem:[#allocation2 + $0x2e0] ss:$16 sps:$4 sm:$0xff]   ;;  %v3288_v17 = vld [vmem:[#allocation2 + $0x304] ss:$16 sps:$4 sm:$0xff]   ;;  %v3285_v22 = vld [vmem:[#allocation2 + $0x2cc] ss:$16 sps:$4 sm:$0xff]  }
  0x45   :  { %1646 = vmatpush1.bf16.msra.mxu1 %v3163_v44  ;;  %v3240_v44 = vld [vmem:[#allocation2 + $0x204] ss:$16 sps:$4 sm:$0xff]   ;;  %v3286_v20 = vld [vmem:[#allocation2 + $0x300] ss:$16 sps:$4 sm:$0xff]   ;;  %v3289_v27 = vld [vmem:[#allocation2 + $0x2e8] ss:$16 sps:$4 sm:$0xff]  }
  0x46   :  { %1480 = vmatpush1.bf16.msra.mxu0 %v3174_v45  ;;  %1647 = vmatprep.subr.bf16.mxu1 %v3171_v47  ;;  %v3219_v45 = vld [vmem:[#allocation2 + $0x1ac] ss:$16 sps:$4 sm:$0xff]   ;;  %v3217_v47 = vld [vmem:[#allocation2 + $0x1a8] ss:$16 sps:$4 sm:$0xff]   ;;  %v3294_v21 = vld [vmem:[#allocation2 + $0x324] ss:$16 sps:$4 sm:$0xff]  }
  0x47   :  { %1481 = vmatprep.subr.bf16.mxu0 %v3178_v46  ;;  %v256_v46 = vpack.c.bf16 %v203_v39, %v132_v38  ;;  %v3292_v24 = vld [vmem:[#allocation2 + $0x320] ss:$16 sps:$4 sm:$0xff]   ;;  %v3300_v25 = vld [vmem:[#allocation2 + $0x344] ss:$16 sps:$4 sm:$0xff]   ;;  %v3303_v35 = vld [vmem:[#allocation2 + $0x32c] ss:$16 sps:$4 sm:$0xff]  }
  0x48   :  { %v3298_v28 = vld [vmem:[#allocation2 + $0x340] ss:$16 sps:$4 sm:$0xff]   ;;  %v3306_v30 = vld [vmem:[#allocation2 + $0x364] ss:$16 sps:$4 sm:$0xff]   ;;  %vm2642_vm2 = vcmask 523264  }
  0x49   :  { %1648 = vmatpush1.bf16.msra.mxu1 %v3169_v48  ;;  %v3238_v48 = vld [vmem:[#allocation2 + $0x200] ss:$16 sps:$4 sm:$0xff]   ;;  %v3318_v39 = vld [vmem:[#allocation2 + $0x3a4] ss:$16 sps:$4 sm:$0xff]  }
  0x4a   :  { %1482 = vmatpush1.bf16.msra.mxu0 %v3180_v49  ;;  %1649 = vmatprep.subr.bf16.mxu1 %v3177_v51  ;;  %v259_v49 = vpack.c.bf16 %v206_v43, %v135_v42  ;;  %v3225_v51 = vld [vmem:[#allocation2 + $0x1cc] ss:$16 sps:$4 sm:$0xff]   ;;  %v3304_v33 = vld [vmem:[#allocation2 + $0x360] ss:$16 sps:$4 sm:$0xff]   ;;  %v3324_v43 = vld [vmem:[#allocation2 + $0x3c4] ss:$16 sps:$4 sm:$0xff]  }
  0x4b   :  { %1483 = vmatprep.subr.bf16.mxu0 %v3184_v50  ;;  %v3246_v50 = vld [vmem:[#allocation2 + $0x224] ss:$16 sps:$4 sm:$0xff]   ;;  %v3310_v38 = vld [vmem:[#allocation2 + $0x380] ss:$16 sps:$4 sm:$0xff]  }
  0x4c   :  { %v3316_v42 = vld [vmem:[#allocation2 + $0x3a0] ss:$16 sps:$4 sm:$0xff]  }
  0x4d   :  { %1650 = vmatpush1.bf16.msra.mxu1 %v3175_v52  ;;  %v3223_v52 = vld [vmem:[#allocation2 + $0x1c8] ss:$16 sps:$4 sm:$0xff]  }
  0x4e   :  { %1484 = vmatpush1.bf16.msra.mxu0 %v3186_v53  ;;  %1651 = vmatprep.subr.bf16.mxu1 %v3183_v55  ;;  %v3244_v53 = vld [vmem:[#allocation2 + $0x220] ss:$16 sps:$4 sm:$0xff]   ;;  %v3243_v55 = vld [vmem:[#allocation2 + $0x1ec] ss:$16 sps:$4 sm:$0xff]  }
  0x4f   :  { %1485 = vmatprep.subr.bf16.mxu0 %v3190_v54  ;;  %v3252_v54 = vld [vmem:[#allocation2 + $0x244] ss:$16 sps:$4 sm:$0xff]  }
  0x51   :  { %1652 = vmatpush1.bf16.msra.mxu1 %v3181_v56  ;;  %v3241_v56 = vld [vmem:[#allocation2 + $0x1e8] ss:$16 sps:$4 sm:$0xff]  }
  0x52   :  { %1486 = vmatpush1.bf16.msra.mxu0 %v3192_v57  ;;  %1653 = vmatprep.subr.bf16.mxu1 %v3189_v59  ;;  %v3250_v57 = vld [vmem:[#allocation2 + $0x240] ss:$16 sps:$4 sm:$0xff]   ;;  %v3249_v59 = vld [vmem:[#allocation2 + $0x20c] ss:$16 sps:$4 sm:$0xff]  }
  0x53   :  { %1487 = vmatprep.subr.bf16.mxu0 %v3196_v58  ;;  %v3258_v58 = vld [vmem:[#allocation2 + $0x264] ss:$16 sps:$4 sm:$0xff]  }
  0x55   :  { %1654 = vmatpush1.bf16.msra.mxu1 %v3187_v60  ;;  %v3247_v60 = vld [vmem:[#allocation2 + $0x208] ss:$16 sps:$4 sm:$0xff]  }
  0x56   :  { %1488 = vmatpush1.bf16.msra.mxu0 %v3198_v62  ;;  %1655 = vmatprep.subr.bf16.mxu1 %v3195_v61  ;;  %v3256_v61 = vld [vmem:[#allocation2 + $0x260] ss:$16 sps:$4 sm:$0xff]   ;;  %v3264_v62 = vld [vmem:[#allocation2 + $0x284] ss:$16 sps:$4 sm:$0xff]  }
  0x57   :  { %1489 = vmatprep.subr.bf16.mxu0 %v3202_v63  ;;  %v3255_v63 = vld [vmem:[#allocation2 + $0x22c] ss:$16 sps:$4 sm:$0xff]  }
  0x59   :  { %1656 = vmatpush1.bf16.msra.mxu1 %v3193_v2  ;;  %v3262_v2 = vld [vmem:[#allocation2 + $0x280] ss:$16 sps:$4 sm:$0xff]  }
  0x5a   :  { %1490 = vmatpush1.bf16.msra.mxu0 %v3204_v1  ;;  %1657 = vmatprep.subr.bf16.mxu1 %v3201_v4  ;;  %v3253_v1 = vld [vmem:[#allocation2 + $0x228] ss:$16 sps:$4 sm:$0xff]   ;;  %v3261_v4 = vld [vmem:[#allocation2 + $0x24c] ss:$16 sps:$4 sm:$0xff]  }
  0x5b   :  { %1491 = vmatprep.subr.bf16.mxu0 %v3208_v3  ;;  %v3270_v3 = vld [vmem:[#allocation2 + $0x2a4] ss:$16 sps:$4 sm:$0xff]  }
  0x5d   :  { %1658 = vmatpush1.bf16.msra.mxu1 %v3199_v18  ;;  %v3279_v18 = vld [vmem:[#allocation2 + $0x2ac] ss:$16 sps:$4 sm:$0xff]  }
  0x5e   :  { %1492 = vmatpush1.bf16.msra.mxu0 %v3210_v19  ;;  %1659 = vmatprep.subr.bf16.mxu1 %v3207_v26  ;;  %v3277_v19 = vld [vmem:[#allocation2 + $0x2a8] ss:$16 sps:$4 sm:$0xff]   ;;  %v3291_v26 = vld [vmem:[#allocation2 + $0x2ec] ss:$16 sps:$4 sm:$0xff]  }
  0x5f   :  { %1493 = vmatprep.subr.bf16.mxu0 %v3214_v23  ;;  %v3283_v23 = vld [vmem:[#allocation2 + $0x2c8] ss:$16 sps:$4 sm:$0xff]  }
  0x61   :  { %1660 = vmatpush1.bf16.msra.mxu1 %v3205_v31  ;;  %v3297_v31 = vld [vmem:[#allocation2 + $0x30c] ss:$16 sps:$4 sm:$0xff]  }
  0x62   :  { %1494 = vmatpush1.bf16.msra.mxu0 %v3216_v32  ;;  %1661 = vmatprep.subr.bf16.mxu1 %v3213_v36  ;;  %v3295_v32 = vld [vmem:[#allocation2 + $0x308] ss:$16 sps:$4 sm:$0xff]  }
  0x63   :  { %1495 = vmatprep.subr.bf16.mxu0 %v3220_v34  ;;  %v3312_v34 = vld [vmem:[#allocation2 + $0x384] ss:$16 sps:$4 sm:$0xff]   ;;  %v3301_v36 = vld [vmem:[#allocation2 + $0x328] ss:$16 sps:$4 sm:$0xff]  }
  0x65   :  { %1662 = vmatpush1.bf16.msra.mxu1 %v3211_v40  ;;  %v3309_v40 = vld [vmem:[#allocation2 + $0x34c] ss:$16 sps:$4 sm:$0xff]  }
  0x66   :  { %1496 = vmatpush1.bf16.msra.mxu0 %v3222_v41  ;;  %1663 = vmatprep.subr.bf16.mxu1 %v3219_v45  ;;  %v3307_v41 = vld [vmem:[#allocation2 + $0x348] ss:$16 sps:$4 sm:$0xff]  }
  0x67   :  { %1508 = vmatprep.subr.bf16.mxu0 %v3240_v44  ;;  %v3315_v44 = vld [vmem:[#allocation2 + $0x36c] ss:$16 sps:$4 sm:$0xff]   ;;  %v3313_v45 = vld [vmem:[#allocation2 + $0x368] ss:$16 sps:$4 sm:$0xff]  }
  0x69   :  { %1498 = vmatmul.mubr.bf16.vlgmr.msra.gmra.mrb[0].mxu0 %v256_v46  ;;  %1664 = vmatpush1.bf16.msra.mxu1 %v3217_v47  ;;  %v3330_v47 = vld [vmem:[#allocation2 + $0x3e4] ss:$16 sps:$4 sm:$0xff]  }
  0x6a   :  { %1509 = vmatpush1.bf16.msra.mxu0 %v3238_v48  ;;  %1540 = vmatprep.mubr.bf16.mxu0 %v259_v49  ;;  %v3321_v48 = vld [vmem:[#allocation2 + $0x38c] ss:$16 sps:$4 sm:$0xff]  }
  0x6b   :  { %1510 = vmatprep.subr.bf16.mxu0 %v3246_v50  ;;  %1665 = vmatprep.subr.bf16.mxu1 %v3225_v51  ;;  %v3328_v50 = vld [vmem:[#allocation2 + $0x3e0] ss:$16 sps:$4 sm:$0xff]   ;;  %v3336_v51 = vld [vmem:[#allocation2 + $0x404] ss:$16 sps:$4 sm:$0xff]  }
  0x6d   :  { %1666 = vmatpush1.bf16.msra.mxu1 %v3223_v52  ;;  %v3327_v52 = vld [vmem:[#allocation2 + $0x3ac] ss:$16 sps:$4 sm:$0xff]  }
  0x6e   :  { %1511 = vmatpush1.bf16.msra.mxu0 %v3244_v53  ;;  %1667 = vmatprep.subr.bf16.mxu1 %v3243_v55  ;;  %v3325_v53 = vld [vmem:[#allocation2 + $0x3a8] ss:$16 sps:$4 sm:$0xff]   ;;  %v3342_v55 = vld [vmem:[#allocation2 + $0x424] ss:$16 sps:$4 sm:$0xff]  }
  0x6f   :  { %1512 = vmatprep.subr.bf16.mxu0 %v3252_v54  ;;  %v3334_v54 = vld [vmem:[#allocation2 + $0x400] ss:$16 sps:$4 sm:$0xff]  }
  0x71   :  { %1668 = vmatpush1.bf16.msra.mxu1 %v3241_v56  ;;  %v3333_v56 = vld [vmem:[#allocation2 + $0x3cc] ss:$16 sps:$4 sm:$0xff]  }
  0x72   :  { %1513 = vmatpush1.bf16.msra.mxu0 %v3250_v57  ;;  %1680 = vmatprep.subr.bf16.mxu1 %v3249_v59  ;;  %v3331_v57 = vld [vmem:[#allocation2 + $0x3c8] ss:$16 sps:$4 sm:$0xff]   ;;  %v3348_v59 = vld [vmem:[#allocation2 + $0x444] ss:$16 sps:$4 sm:$0xff]  }
  0x73   :  { %1514 = vmatprep.subr.bf16.mxu0 %v3258_v58  ;;  %v3340_v58 = vld [vmem:[#allocation2 + $0x420] ss:$16 sps:$4 sm:$0xff]  }
  0x74   :  { %1670 = vmatmul.mubr.bf16.vlgmr.msra.gmra.mrb[4].mxu1 %v256_v46  ;;  %v3322_v46 = vld [vmem:[#allocation2 + $0x3c0] ss:$16 sps:$4 sm:$0xff]  }
  0x75   :  { %1681 = vmatpush1.bf16.msra.mxu1 %v3247_v60  ;;  %1712 = vmatprep.mubr.bf16.mxu1 %v259_v49  ;;  %v3319_v49 = vld [vmem:[#allocation2 + $0x388] ss:$16 sps:$4 sm:$0xff]   ;;  %v3339_v60 = vld [vmem:[#allocation2 + $0x3ec] ss:$16 sps:$4 sm:$0xff]  }
  0x76   :  { %1515 = vmatpush1.bf16.msra.mxu0 %v3256_v61  ;;  %1682 = vmatprep.subr.bf16.mxu1 %v3255_v63  ;;  %v3337_v61 = vld [vmem:[#allocation2 + $0x3e8] ss:$16 sps:$4 sm:$0xff]   ;;  %v3346_v63 = vld [vmem:[#allocation2 + $0x440] ss:$16 sps:$4 sm:$0xff]  }
  0x77   :  { %1516 = vmatprep.subr.bf16.mxu0 %v3264_v62  ;;  %v3345_v62 = vld [vmem:[#allocation2 + $0x40c] ss:$16 sps:$4 sm:$0xff]  }
  0x79   :  { %1683 = vmatpush1.bf16.msra.mxu1 %v3253_v1  ;;  %v3354_v1 = vld [vmem:[#allocation2 + $0x464] ss:$16 sps:$4 sm:$0xff]  }
  0x7a   :  { %1517 = vmatpush1.bf16.msra.mxu0 %v3262_v2  ;;  %1684 = vmatprep.subr.bf16.mxu1 %v3261_v4  ;;  %v3430_v2 = vld [vmem:[%s3981_s0 + $0x8] ss:$14 sps:$4 sm:$0xff]   ;;  %v3432_v4 = vld [vmem:[%s3981_s0 + $0x40] ss:$14 sps:$4 sm:$0xff]  }
  0x7b   :  { %1518 = vmatprep.subr.bf16.mxu0 %v3270_v3  ;;  %v3431_v3 = vld [vmem:[%s3981_s0 + $0x24] ss:$14 sps:$4 sm:$0xff]  }
  0x7d   :  { %1685 = vmatpush1.bf16.msra.mxu1 %v3259_v5  ;;  %v3433_v5 = vld [vmem:[%s3981_s0 + $0x5c] ss:$14 sps:$4 sm:$0xff]  }
  0x7e   :  { %1519 = vmatpush1.bf16.msra.mxu0 %v3268_v6  ;;  %1686 = vmatprep.subr.bf16.mxu1 %v3267_v8  ;;  %v3807_v6 = vrot.slane %v3430_v2, %v3737_v13  ;;  %v3813_v8 = vrot.slane %v3432_v4, %v3737_v13  ;;  %v3442_v4 = vld [vmem:[#allocation5 + $0x4] ss:$8 sps:$4 sm:$0xff]  }
  0x7f   :  { %1520 = vmatprep.subr.bf16.mxu0 %v3276_v7  ;;  %v3810_v7 = vrot.slane %v3431_v3, %v3737_v13 }
  0x81   :  { %1687 = vmatpush1.bf16.msra.mxu1 %v3265_v10  ;;  %v3343_v10 = vld [vmem:[#allocation2 + $0x408] ss:$16 sps:$4 sm:$0xff]   ;;  %v168_v2 = vcombine.low %v3807_v6, %v3810_v7 }
  0x82   :  { %1521 = vmatpush1.bf16.msra.mxu0 %v3274_v11  ;;  %1688 = vmatprep.subr.bf16.mxu1 %v3273_v14  ;;  %v3352_v11 = vld [vmem:[#allocation2 + $0x460] ss:$16 sps:$4 sm:$0xff]   ;;  %v3360_v14 = vld [vmem:[#allocation2 + $0x484] ss:$16 sps:$4 sm:$0xff]  }
  0x83   :  { %1522 = vmatprep.subr.bf16.mxu0 %v3282_v12  ;;  %v3816_v12 = vrot.slane %v3433_v5, %v3737_v13  ;;  %v3366_v13 = vld [vmem:[#allocation2 + $0x4a4] ss:$16 sps:$4 sm:$0xff]   ;;  %v3423_v5 = vld [vmem:[#allocation2 + $0x5ac] ss:$16 sps:$4 sm:$0xff]  }
  0x85   :  { %1689 = vmatpush1.bf16.msra.mxu1 %v3271_v15  ;;  %v169_v15 = vcombine.high %v3807_v6, %v3810_v7  ;;  %v239_v3 = vcombine.low %v3813_v8, %v3816_v12  ;;  %v3443_v6 = vld [vmem:[#allocation5 + $0x10] ss:$8 sps:$4 sm:$0xff]  }
  0x86   :  { %1523 = vmatpush1.bf16.msra.mxu0 %v3280_v16  ;;  %1690 = vmatprep.subr.bf16.mxu1 %v3279_v18  ;;  %v3351_v16 = vld [vmem:[#allocation2 + $0x42c] ss:$16 sps:$4 sm:$0xff]   ;;  %v3349_v18 = vld [vmem:[#allocation2 + $0x428] ss:$16 sps:$4 sm:$0xff]  }
  0x87   :  { %1524 = vmatprep.subr.bf16.mxu0 %v3288_v17  ;;  %v240_v17 = vcombine.high %v3813_v8, %v3816_v12  ;;  %v3427_v7 = vld [vmem:[#allocation2 + $0x5c8] ss:$16 sps:$4 sm:$0xff]   ;;  %v3448_v8 = vld [vmem:[#allocation5 + $0x24] ss:$8 sps:$4 sm:$0xff]  }
  0x88   :  { %v3436_v12 = vld [vmem:[#allocation2 + $0x5ec] ss:$16 sps:$4 sm:$0xff]  }
  0x89   :  { %1691 = vmatpush1.bf16.msra.mxu1 %v3277_v19  ;;  %v3358_v19 = vld [vmem:[#allocation2 + $0x480] ss:$16 sps:$4 sm:$0xff]  }
  0x8a   :  { %1525 = vmatpush1.bf16.msra.mxu0 %v3286_v20  ;;  %1692 = vmatprep.subr.bf16.mxu1 %v3285_v22  ;;  %v261_v20 = vpack.c.bf16 %v240_v17, %v169_v15  ;;  %v3355_v22 = vld [vmem:[#allocation2 + $0x448] ss:$16 sps:$4 sm:$0xff]   ;;  %v3445_v15 = vld [vmem:[#allocation5 + $0x14] ss:$8 sps:$4 sm:$0xff]  }
  0x8b   :  { %1526 = vmatprep.subr.bf16.mxu0 %v3294_v21  ;;  %v3357_v21 = vld [vmem:[#allocation2 + $0x44c] ss:$16 sps:$4 sm:$0xff]   ;;  %v3446_v17 = vld [vmem:[#allocation5 + $0x20] ss:$8 sps:$4 sm:$0xff]  }
  0x8d   :  { %1693 = vmatpush1.bf16.msra.mxu1 %v3283_v23  ;;  %v3364_v23 = vld [vmem:[#allocation2 + $0x4a0] ss:$16 sps:$4 sm:$0xff]  }
  0x8e   :  { %1527 = vmatpush1.bf16.msra.mxu0 %v3292_v24  ;;  %1694 = vmatprep.subr.bf16.mxu1 %v3291_v26  ;;  %v3372_v24 = vld [vmem:[#allocation2 + $0x4c4] ss:$16 sps:$4 sm:$0xff]   ;;  %v3370_v26 = vld [vmem:[#allocation2 + $0x4c0] ss:$16 sps:$4 sm:$0xff]  }
  0x8f   :  { %1528 = vmatprep.subr.bf16.mxu0 %v3300_v25  ;;  %v3363_v25 = vld [vmem:[#allocation2 + $0x46c] ss:$16 sps:$4 sm:$0xff]  }
  0x91   :  { %1695 = vmatpush1.bf16.msra.mxu1 %v3289_v27  ;;  %v3378_v27 = vld [vmem:[#allocation2 + $0x4e4] ss:$16 sps:$4 sm:$0xff]  }
  0x92   :  { %1529 = vmatpush1.bf16.msra.mxu0 %v3298_v28  ;;  %1696 = vmatprep.subr.bf16.mxu1 %v3297_v31  ;;  %v3369_v28 = vld [vmem:[#allocation2 + $0x48c] ss:$16 sps:$4 sm:$0xff]   ;;  %v3376_v31 = vld [vmem:[#allocation2 + $0x4e0] ss:$16 sps:$4 sm:$0xff]  }
  0x93   :  { %1530 = vmatprep.subr.bf16.mxu0 %v3306_v30  ;;  %v3367_v30 = vld [vmem:[#allocation2 + $0x488] ss:$16 sps:$4 sm:$0xff]  }
  0x95   :  { %1697 = vmatpush1.bf16.msra.mxu1 %v3295_v32  ;;  %v3384_v32 = vld [vmem:[#allocation2 + $0x504] ss:$16 sps:$4 sm:$0xff]  }
  0x96   :  { %1531 = vmatpush1.bf16.msra.mxu0 %v3304_v33  ;;  %1698 = vmatprep.subr.bf16.mxu1 %v3303_v35  ;;  %v3375_v33 = vld [vmem:[#allocation2 + $0x4ac] ss:$16 sps:$4 sm:$0xff]   ;;  %v3373_v35 = vld [vmem:[#allocation2 + $0x4a8] ss:$16 sps:$4 sm:$0xff]  }
  0x97   :  { %1532 = vmatprep.subr.bf16.mxu0 %v3312_v34  ;;  %v3382_v34 = vld [vmem:[#allocation2 + $0x500] ss:$16 sps:$4 sm:$0xff]  }
  0x99   :  { %1699 = vmatpush1.bf16.msra.mxu1 %v3301_v36  ;;  %v3390_v36 = vld [vmem:[#allocation2 + $0x524] ss:$16 sps:$4 sm:$0xff]  }
  0x9a   :  { %1533 = vmatpush1.bf16.msra.mxu0 %v3310_v38  ;;  %1700 = vmatprep.subr.bf16.mxu1 %v3309_v40  ;;  %v3381_v38 = vld [vmem:[#allocation2 + $0x4cc] ss:$16 sps:$4 sm:$0xff]   ;;  %v3379_v40 = vld [vmem:[#allocation2 + $0x4c8] ss:$16 sps:$4 sm:$0xff]  }
  0x9b   :  { %1534 = vmatprep.subr.bf16.mxu0 %v3318_v39  ;;  %v3388_v39 = vld [vmem:[#allocation2 + $0x520] ss:$16 sps:$4 sm:$0xff]  }
  0x9d   :  { %1701 = vmatpush1.bf16.msra.mxu1 %v3307_v41  ;;  %v3396_v41 = vld [vmem:[#allocation2 + $0x544] ss:$16 sps:$4 sm:$0xff]  }
  0x9e   :  { %1535 = vmatpush1.bf16.msra.mxu0 %v3316_v42  ;;  %1702 = vmatprep.subr.bf16.mxu1 %v3315_v44  ;;  %v3387_v42 = vld [vmem:[#allocation2 + $0x4ec] ss:$16 sps:$4 sm:$0xff]   ;;  %v3385_v44 = vld [vmem:[#allocation2 + $0x4e8] ss:$16 sps:$4 sm:$0xff]  }
  0x9f   :  { %1536 = vmatprep.subr.bf16.mxu0 %v3324_v43  ;;  %v3394_v43 = vld [vmem:[#allocation2 + $0x540] ss:$16 sps:$4 sm:$0xff]  }
  0xa1   :  { %1703 = vmatpush1.bf16.msra.mxu1 %v3313_v45  ;;  %v3402_v45 = vld [vmem:[#allocation2 + $0x564] ss:$16 sps:$4 sm:$0xff]  }
  0xa2   :  { %1537 = vmatpush1.bf16.msra.mxu0 %v3322_v46  ;;  %1704 = vmatprep.subr.bf16.mxu1 %v3321_v48  ;;  %v3393_v46 = vld [vmem:[#allocation2 + $0x50c] ss:$16 sps:$4 sm:$0xff]   ;;  %v3391_v48 = vld [vmem:[#allocation2 + $0x508] ss:$16 sps:$4 sm:$0xff]  }
  0xa3   :  { %1538 = vmatprep.subr.bf16.mxu0 %v3330_v47  ;;  %v3400_v47 = vld [vmem:[#allocation2 + $0x560] ss:$16 sps:$4 sm:$0xff]  }
  0xa5   :  { %1705 = vmatpush1.bf16.msra.mxu1 %v3319_v49  ;;  %v3408_v49 = vld [vmem:[#allocation2 + $0x584] ss:$16 sps:$4 sm:$0xff]  }
  0xa6   :  { %1539 = vmatpush1.bf16.msra.mxu0 %v3328_v50  ;;  %1706 = vmatprep.subr.bf16.mxu1 %v3327_v52  ;;  %v3399_v50 = vld [vmem:[#allocation2 + $0x52c] ss:$16 sps:$4 sm:$0xff]   ;;  %v3397_v52 = vld [vmem:[#allocation2 + $0x528] ss:$16 sps:$4 sm:$0xff]  }
  0xa7   :  { %1551 = vmatprep.subr.bf16.mxu0 %v3336_v51  ;;  %v3406_v51 = vld [vmem:[#allocation2 + $0x580] ss:$16 sps:$4 sm:$0xff]  }
  0xa9   :  { %1541 = vmatmul.mubr.bf16.vlgmr.msra.gmra.mrb[0].mxu0 %v3791_v37  ;;  %1707 = vmatpush1.bf16.msra.mxu1 %v3325_v53  ;;  %v3414_v53 = vld [vmem:[#allocation2 + $0x5a4] ss:$16 sps:$4 sm:$0xff]  }
  0xaa   :  { %1552 = vmatpush1.bf16.msra.mxu0 %v3334_v54  ;;  %1708 = vmatprep.subr.bf16.mxu1 %v3333_v56  ;;  %v3405_v54 = vld [vmem:[#allocation2 + $0x54c] ss:$16 sps:$4 sm:$0xff]   ;;  %v3403_v56 = vld [vmem:[#allocation2 + $0x548] ss:$16 sps:$4 sm:$0xff]  }
  0xab   :  { %1553 = vmatprep.subr.bf16.mxu0 %v3342_v55  ;;  %1583 = vmatprep.mubr.bf16.mxu0 %v261_v20  ;;  %v3412_v55 = vld [vmem:[#allocation2 + $0x5a0] ss:$16 sps:$4 sm:$0xff]  }
  0xad   :  { %1709 = vmatpush1.bf16.msra.mxu1 %v3331_v57  ;;  %v3420_v57 = vld [vmem:[#allocation2 + $0x5c4] ss:$16 sps:$4 sm:$0xff]  }
  0xae   :  { %1554 = vmatpush1.bf16.msra.mxu0 %v3340_v58  ;;  %1710 = vmatprep.subr.bf16.mxu1 %v3339_v60  ;;  %v3411_v58 = vld [vmem:[#allocation2 + $0x56c] ss:$16 sps:$4 sm:$0xff]   ;;  %v3409_v60 = vld [vmem:[#allocation2 + $0x568] ss:$16 sps:$4 sm:$0xff]  }
  0xaf   :  { %1555 = vmatprep.subr.bf16.mxu0 %v3348_v59  ;;  %v3418_v59 = vld [vmem:[#allocation2 + $0x5c0] ss:$16 sps:$4 sm:$0xff]  }
  0xb1   :  { %1711 = vmatpush1.bf16.msra.mxu1 %v3337_v61  ;;  %v3426_v61 = vld [vmem:[#allocation2 + $0x5e4] ss:$16 sps:$4 sm:$0xff]  }
  0xb2   :  { %1556 = vmatpush1.bf16.msra.mxu0 %v3346_v63  ;;  %1723 = vmatprep.subr.bf16.mxu1 %v3345_v62  ;;  %v3417_v62 = vld [vmem:[#allocation2 + $0x58c] ss:$16 sps:$4 sm:$0xff]   ;;  %v3424_v63 = vld [vmem:[#allocation2 + $0x5e0] ss:$16 sps:$4 sm:$0xff]  }
  0xb3   :  { %1557 = vmatprep.subr.bf16.mxu0 %v3354_v1  ;;  %v3415_v1 = vld [vmem:[#allocation2 + $0x588] ss:$16 sps:$4 sm:$0xff]  }
  0xb4   :  { %1713 = vmatmul.mubr.bf16.vlgmr.msra.gmra.mrb[4].mxu1 %v3791_v37  ;;  %v3361_v37 = vld [vmem:[#allocation2 + $0x468] ss:$16 sps:$4 sm:$0xff]  }
  0xb5   :  { %1724 = vmatpush1.bf16.msra.mxu1 %v3343_v10  ;;  %1755 = vmatprep.mubr.bf16.mxu1 %v261_v20  ;;  %v260_v10 = vpack.c.bf16 %v239_v3, %v168_v2  ;;  %v3439_v20 = vld [vmem:[#allocation2 + $0x60c] ss:$16 sps:$4 sm:$0xff]  }
  0xb6   :  { %1558 = vmatpush1.bf16.msra.mxu0 %v3352_v11  ;;  %1725 = vmatprep.subr.bf16.mxu1 %v3351_v16  ;;  %v3440_v11 = vld [vmem:[#allocation5] ss:$8 sps:$4 sm:$0xff]   ;;  %v3429_v16 = vld [vmem:[#allocation2 + $0x5cc] ss:$16 sps:$4 sm:$0xff]  }
  0xb7   :  { %1559 = vmatprep.subr.bf16.mxu0 %v3360_v14  ;;  %v3421_v14 = vld [vmem:[#allocation2 + $0x5a8] ss:$16 sps:$4 sm:$0xff]  }
  0xb9   :  { %1726 = vmatpush1.bf16.msra.mxu1 %v3349_v18  ;;  %v3434_v18 = vld [vmem:[#allocation2 + $0x5e8] ss:$16 sps:$4 sm:$0xff]  }
  0xba   :  { %1560 = vmatpush1.bf16.msra.mxu0 %v3358_v19  ;;  %1727 = vmatprep.subr.bf16.mxu1 %v3357_v21  ;;  %v3451_v19 = vld [vmem:[#allocation5 + $0x34] ss:$8 sps:$4 sm:$0xff]   ;;  %v3437_v21 = vld [vmem:[#allocation2 + $0x608] ss:$16 sps:$4 sm:$0xff]  }
  0xbb   :  { %1561 = vmatprep.subr.bf16.mxu0 %v3366_v13  ;;  %v3449_v13 = vld [vmem:[#allocation5 + $0x30] ss:$8 sps:$4 sm:$0xff]  }
  0xbd   :  { %1728 = vmatpush1.bf16.msra.mxu1 %v3355_v22  ;;  %v3454_v22 = vld [vmem:[#allocation5 + $0x44] ss:$8 sps:$4 sm:$0xff]  }
  0xbe   :  { %1562 = vmatpush1.bf16.msra.mxu0 %v3364_v23  ;;  %1729 = vmatprep.subr.bf16.mxu1 %v3363_v25  ;;  %v3452_v23 = vld [vmem:[#allocation5 + $0x40] ss:$8 sps:$4 sm:$0xff]   ;;  %v3455_v25 = vld [vmem:[#allocation5 + $0x50] ss:$8 sps:$4 sm:$0xff]  }
  0xbf   :  { %1563 = vmatprep.subr.bf16.mxu0 %v3372_v24  ;;  %v3457_v24 = vld [vmem:[#allocation5 + $0x54] ss:$8 sps:$4 sm:$0xff]  }
  0xc1   :  { %1730 = vmatpush1.bf16.msra.mxu1 %v3361_v37  ;;  %v3460_v37 = vld [vmem:[#allocation5 + $0x64] ss:$8 sps:$4 sm:$0xff]  }
  0xc2   :  { %1564 = vmatpush1.bf16.msra.mxu0 %v3370_v26  ;;  %1731 = vmatprep.subr.bf16.mxu1 %v3369_v28  ;;  %v3458_v26 = vld [vmem:[#allocation5 + $0x60] ss:$8 sps:$4 sm:$0xff]   ;;  %v3461_v28 = vld [vmem:[#allocation5 + $0x70] ss:$8 sps:$4 sm:$0xff]  }
  0xc3   :  { %1565 = vmatprep.subr.bf16.mxu0 %v3378_v27  ;;  %v3463_v27 = vld [vmem:[#allocation5 + $0x74] ss:$8 sps:$4 sm:$0xff]  }
  0xc5   :  { %1732 = vmatpush1.bf16.msra.mxu1 %v3367_v30  ;;  %v3466_v30 = vld [vmem:[#allocation5 + $0x84] ss:$8 sps:$4 sm:$0xff]  }
  0xc6   :  { %1566 = vmatpush1.bf16.msra.mxu0 %v3376_v31  ;;  %1733 = vmatprep.subr.bf16.mxu1 %v3375_v33  ;;  %v3464_v31 = vld [vmem:[#allocation5 + $0x80] ss:$8 sps:$4 sm:$0xff]  }
  0xc7   :  { %1567 = vmatprep.subr.bf16.mxu0 %v3384_v32 }
  0xc9   :  { %1734 = vmatpush1.bf16.msra.mxu1 %v3373_v35 }
  0xca   :  { %1568 = vmatpush1.bf16.msra.mxu0 %v3382_v34  ;;  %1735 = vmatprep.subr.bf16.mxu1 %v3381_v38  ;;  %v3467_v34 = vld [vmem:[#allocation5 + $0x90] ss:$8 sps:$4 sm:$0xff]  }
  0xcb   :  { %1569 = vmatprep.subr.bf16.mxu0 %v3390_v36  ;;  %v3472_v36 = vld [vmem:[#allocation5 + $0xa4] ss:$8 sps:$4 sm:$0xff]  }
  0xcd   :  { %1736 = vmatpush1.bf16.msra.mxu1 %v3379_v40  ;;  %v3473_v40 = vld [vmem:[#allocation5 + $0xb0] ss:$8 sps:$4 sm:$0xff]  }
  0xce   :  { %1570 = vmatpush1.bf16.msra.mxu0 %v3388_v39  ;;  %1737 = vmatprep.subr.bf16.mxu1 %v3387_v42  ;;  %v3475_v39 = vld [vmem:[#allocation5 + $0xb4] ss:$8 sps:$4 sm:$0xff]   ;;  %v3476_v42 = vld [vmem:[#allocation5 + $0xc0] ss:$8 sps:$4 sm:$0xff]  }
  0xcf   :  { %1571 = vmatprep.subr.bf16.mxu0 %v3396_v41  ;;  %v3478_v41 = vld [vmem:[#allocation5 + $0xc4] ss:$8 sps:$4 sm:$0xff]  }
  0xd1   :  { %1738 = vmatpush1.bf16.msra.mxu1 %v3385_v44  ;;  %v3481_v44 = vld [vmem:[#allocation5 + $0xd4] ss:$8 sps:$4 sm:$0xff]  }
  0xd2   :  { %1572 = vmatpush1.bf16.msra.mxu0 %v3394_v43  ;;  %1739 = vmatprep.subr.bf16.mxu1 %v3393_v46  ;;  %v3479_v43 = vld [vmem:[#allocation5 + $0xd0] ss:$8 sps:$4 sm:$0xff]   ;;  %v3484_v46 = vld [vmem:[#allocation5 + $0xe4] ss:$8 sps:$4 sm:$0xff]  }
  0xd3   :  { %1573 = vmatprep.subr.bf16.mxu0 %v3402_v45  ;;  %v3482_v45 = vld [vmem:[#allocation5 + $0xe0] ss:$8 sps:$4 sm:$0xff]  }
  0xd5   :  { %1740 = vmatpush1.bf16.msra.mxu1 %v3391_v48  ;;  %v3485_v48 = vld [vmem:[#allocation5 + $0xf0] ss:$8 sps:$4 sm:$0xff]  }
  0xd6   :  { %1574 = vmatpush1.bf16.msra.mxu0 %v3400_v47  ;;  %1741 = vmatprep.subr.bf16.mxu1 %v3399_v50  ;;  %v3487_v47 = vld [vmem:[#allocation5 + $0xf4] ss:$8 sps:$4 sm:$0xff]   ;;  %v3536_v50 = vld [vmem:[%s3986_s5 + $0x40] sm:$0xff]  }
  0xd7   :  { %1575 = vmatprep.subr.bf16.mxu0 %v3408_v49  ;;  %v3490_v49 = vld [vmem:[#allocation5 + $0x104] ss:$8 sps:$4 sm:$0xff]  }
  0xd9   :  { %1742 = vmatpush1.bf16.msra.mxu1 %v3397_v52  ;;  %v3538_v52 = vld [vmem:[%s3986_s5 + $0x48] sm:$0xff]  }
  0xda   :  { %1576 = vmatpush1.bf16.msra.mxu0 %v3406_v51  ;;  %1743 = vmatprep.subr.bf16.mxu1 %v3405_v54  ;;  %v3537_v51 = vld [vmem:[%s3986_s5] sm:$0xff]   ;;  %v3540_v54 = vld [vmem:[%s3986_s5 + $0x50] sm:$0xff]  }
  0xdb   :  { %1577 = vmatprep.subr.bf16.mxu0 %v3414_v53  ;;  %v3539_v53 = vld [vmem:[%s3986_s5 + $0x8] sm:$0xff]  }
  0xdd   :  { %1744 = vmatpush1.bf16.msra.mxu1 %v3403_v56  ;;  %v3542_v56 = vld [vmem:[%s3986_s5 + $0x58] sm:$0xff]  }
  0xde   :  { %1578 = vmatpush1.bf16.msra.mxu0 %v3412_v55  ;;  %1745 = vmatprep.subr.bf16.mxu1 %v3411_v58  ;;  %v3541_v55 = vld [vmem:[%s3986_s5 + $0x10] sm:$0xff]   ;;  %v3544_v58 = vld [vmem:[%s3986_s5 + $0x60] sm:$0xff]  }
  0xdf   :  { %1579 = vmatprep.subr.bf16.mxu0 %v3420_v57  ;;  %v3543_v57 = vld [vmem:[%s3986_s5 + $0x18] sm:$0xff]  }
  0xe1   :  { %1746 = vmatpush1.bf16.msra.mxu1 %v3409_v60  ;;  %v3546_v60 = vld [vmem:[%s3986_s5 + $0x68] sm:$0xff]  }
  0xe2   :  { %1580 = vmatpush1.bf16.msra.mxu0 %v3418_v59  ;;  %1747 = vmatprep.subr.bf16.mxu1 %v3417_v62  ;;  %v3545_v59 = vld [vmem:[%s3986_s5 + $0x20] sm:$0xff]  }
  0xe3   :  { %1581 = vmatprep.subr.bf16.mxu0 %v3426_v61  ;;  %v463_v61 = vsub.s32 0, %v3734_v9  ;;  %v459_v62 = vld [vmem:[%s3983_s2] sm:$0xf] }
  0xe5   :  { %1748 = vmatpush1.bf16.msra.mxu1 %v3415_v1  ;;  %v464_v1 = vrot.slane %v459_v62, %v463_v61 }
  0xe6   :  { %1582 = vmatpush1.bf16.msra.mxu0 %v3424_v63  ;;  %1749 = vmatprep.subr.bf16.mxu1 %v3423_v5  ;;  %v467_v63 = vsub.s32 1, %v3734_v9 }
  0xe7   :  { %2217 = vmatprep.subr.bf16.mxu0 %v3442_v4 }
  0xe8   :  { %v468_v2 = vrot.slane %v459_v62, %v467_v63 }
  0xe9   :  { %1584 = vmatmul.mubr.bf16.vlgmr.msra.gmra.mrb[0].mxu0 %v260_v10  ;;  %1750 = vmatpush1.bf16.msra.mxu1 %v3421_v14 }
  0xea   :  { %2218 = vmatpush1.bf16.msra.mxu0 %v3440_v11  ;;  %1751 = vmatprep.subr.bf16.mxu1 %v3429_v16 }
  0xeb   :  { %2219 = vmatprep.subr.bf16.mxu0 %v3445_v15 }
  0xed   :  { %1752 = vmatpush1.bf16.msra.mxu1 %v3427_v7 }
  0xee   :  { %2220 = vmatpush1.bf16.msra.mxu0 %v3443_v6  ;;  %1753 = vmatprep.subr.bf16.mxu1 %v3436_v12 }
  0xef   :  { %2221 = vmatprep.subr.bf16.mxu0 %v3448_v8 }
  0xf1   :  { %1754 = vmatpush1.bf16.msra.mxu1 %v3434_v18 }
  0xf2   :  { %2222 = vmatpush1.bf16.msra.mxu0 %v3446_v17  ;;  %1766 = vmatprep.subr.bf16.mxu1 %v3439_v20 }
  0xf3   :  { %2223 = vmatprep.subr.bf16.mxu0 %v3451_v19 }
  0xf4   :  { %1756 = vmatmul.mubr.bf16.vlgmr.msra.gmra.mrb[4].mxu1 %v260_v10 }
  0xf5   :  { %1767 = vmatpush1.bf16.msra.mxu1 %v3437_v21  ;;  %1798 = vmatprep.mubr.bf16.mxu1 %v3642_v0  ;;  %v3469_v0 = vld [vmem:[#allocation5 + $0x94] ss:$8 sps:$4 sm:$0xff]  }
  0xf6   :  { %2224 = vmatpush1.bf16.msra.mxu0 %v3449_v13  ;;  %3001 = vmatprep.subr.bf16.mxu1 %v3536_v50 }
  0xf7   :  { %2225 = vmatprep.subr.bf16.mxu0 %v3454_v22  ;;  %v3488_v22 = vld [vmem:[#allocation5 + $0x100] ss:$8 sps:$4 sm:$0xff]  }
  0xfa   :  { %2226 = vmatpush1.bf16.msra.mxu0 %v3452_v23  ;;  %v3493_v23 = vld [vmem:[#allocation5 + $0x114] ss:$8 sps:$4 sm:$0xff]  }
  0xfb   :  { %2227 = vmatprep.subr.bf16.mxu0 %v3457_v24  ;;  %v3491_v24 = vld [vmem:[#allocation5 + $0x110] ss:$8 sps:$4 sm:$0xff]  }
  0xfe   :  { %2228 = vmatpush1.bf16.msra.mxu0 %v3455_v25  ;;  %v3496_v25 = vld [vmem:[#allocation5 + $0x124] ss:$8 sps:$4 sm:$0xff]  }
  0xff   :  { %2229 = vmatprep.subr.bf16.mxu0 %v3460_v37  ;;  %v471_v37 = vsub.s32 2, %v3734_v9 }
 0x100   :  { %2904 = vmatmul.mubr.msk.bf16.vlgmr.msra.gmra.mrb[4].mxu1 %vm1461_vm0, %v3755_v29  ;;  %v3470_v29 = vld [vmem:[#allocation5 + $0xa0] ss:$8 sps:$4 sm:$0xff]  }
 0x101   :  { %3002 = vmatpush3.bf16.msra.mxu1 %v3537_v51  ;;  %v3506_v51 = vld [vmem:[#allocation5 + $0x160] ss:$8 sps:$4 sm:$0xff]  }
 0x102   :  { %2230 = vmatpush1.bf16.msra.mxu0 %v3458_v26  ;;  %3003 = vmatprep.subr.bf16.mxu1 %v3538_v52  ;;  %v3494_v26 = vld [vmem:[#allocation5 + $0x120] ss:$8 sps:$4 sm:$0xff]   ;;  %v3511_v52 = vld [vmem:[#allocation5 + $0x174] ss:$8 sps:$4 sm:$0xff]  }
 0x103   :  { %2231 = vmatprep.subr.bf16.mxu0 %v3463_v27  ;;  %v475_v27 = vsub.s32 3, %v3734_v9  ;;  %v3553_v9 = vld [vmem:[%s3988_s7 + $0x8] sm:$0xff]  }
 0x105   :  { %3004 = vmatpush3.bf16.msra.mxu1 %v3539_v53  ;;  %v3509_v53 = vld [vmem:[#allocation5 + $0x170] ss:$8 sps:$4 sm:$0xff]  }
 0x106   :  { %2232 = vmatpush1.bf16.msra.mxu0 %v3461_v28  ;;  %3005 = vmatprep.subr.bf16.mxu1 %v3540_v54  ;;  %v3499_v28 = vld [vmem:[#allocation5 + $0x134] ss:$8 sps:$4 sm:$0xff]   ;;  %v3514_v54 = vld [vmem:[#allocation5 + $0x184] ss:$8 sps:$4 sm:$0xff]  }
 0x107   :  { %2233 = vmatprep.subr.bf16.mxu0 %v3466_v30  ;;  %v3830_v32 = vpop.f32.mrb[0].mxu1  ;;  %v472_v30 = vrot.slane %v459_v62, %v471_v37 }
 0x108   :  { %v3832_v33 = vpop.f32.mrb[1].mxu1 }
 0x109   :  { %v3834_v35 = vpop.f32.mrb[2].mxu1  ;;  %3006 = vmatpush3.bf16.msra.mxu1 %v3541_v55  ;;  %v3512_v55 = vld [vmem:[#allocation5 + $0x180] ss:$8 sps:$4 sm:$0xff]  }
 0x10a   :  { %2234 = vmatpush1.bf16.msra.mxu0 %v3464_v31  ;;  %v3836_v38 = vpop.f32.mrb[3].mxu1  ;;  %3007 = vmatprep.subr.bf16.mxu1 %v3542_v56  ;;  %v3497_v31 = vld [vmem:[#allocation5 + $0x130] ss:$8 sps:$4 sm:$0xff]   ;;  %v3517_v56 = vld [vmem:[#allocation5 + $0x194] ss:$8 sps:$4 sm:$0xff]  }
 0x10b   :  { %2235 = vmatprep.subr.bf16.mxu0 %v3469_v0  ;;  %v476_v0 = vrot.slane %v459_v62, %v475_v27  ;;  %v3521_v62 = vld [vmem:[#allocation5 + $0x1b0] ss:$8 sps:$4 sm:$0xff]  }
 0x10d   :  { %3008 = vmatpush3.bf16.msra.mxu1 %v3543_v57  ;;  %v3515_v57 = vld [vmem:[#allocation5 + $0x190] ss:$8 sps:$4 sm:$0xff]  }
 0x10e   :  { %2236 = vmatpush1.bf16.msra.mxu0 %v3467_v34  ;;  %3009 = vmatprep.subr.bf16.mxu1 %v3544_v58  ;;  %v3520_v58 = vld [vmem:[#allocation5 + $0x1a4] ss:$8 sps:$4 sm:$0xff]  }
 0x10f   :  { %2237 = vmatprep.subr.bf16.mxu0 %v3472_v36  ;;  %v3500_v36 = vld [vmem:[#allocation5 + $0x140] ss:$8 sps:$4 sm:$0xff]  }
 0x111   :  { %3010 = vmatpush3.bf16.msra.mxu1 %v3545_v59  ;;  %v3518_v59 = vld [vmem:[#allocation5 + $0x1a0] ss:$8 sps:$4 sm:$0xff]  }
 0x112   :  { %2238 = vmatpush1.bf16.msra.mxu0 %v3470_v29  ;;  %3011 = vmatprep.subr.bf16.mxu1 %v3546_v60  ;;  %v3523_v60 = vld [vmem:[#allocation5 + $0x1b4] ss:$8 sps:$4 sm:$0xff]  }
 0x113   :  { %2239 = vmatprep.subr.bf16.mxu0 %v3475_v39  ;;  %v3505_v39 = vld [vmem:[#allocation5 + $0x154] ss:$8 sps:$4 sm:$0xff]  }
 0x116   :  { %2240 = vmatpush1.bf16.msra.mxu0 %v3473_v40 }
 0x117   :  { %2241 = vmatprep.subr.bf16.mxu0 %v3478_v41 }
 0x11a   :  { %2242 = vmatpush1.bf16.msra.mxu0 %v3476_v42 }
 0x11b   :  { %2243 = vmatprep.subr.bf16.mxu0 %v3481_v44 }
 0x11e   :  { %2244 = vmatpush1.bf16.msra.mxu0 %v3479_v43 }
 0x11f   :  { %2245 = vmatprep.subr.bf16.mxu0 %v3484_v46 }
 0x122   :  { %2246 = vmatpush1.bf16.msra.mxu0 %v3482_v45  ;;  %v3503_v45 = vld [vmem:[#allocation5 + $0x150] ss:$8 sps:$4 sm:$0xff]  }
 0x123   :  { %2247 = vmatprep.subr.bf16.mxu0 %v3487_v47 }
 0x126   :  { %2248 = vmatpush1.bf16.msra.mxu0 %v3485_v48  ;;  %v3508_v48 = vld [vmem:[#allocation5 + $0x164] ss:$8 sps:$4 sm:$0xff]  }
 0x127   :  { %2260 = vmatprep.subr.bf16.mxu0 %v3490_v49 }
 0x1bc   :  { %v1585_v3 = vpop.f32.mrb[0].mxu0 }
 0x1bd   :  { %v3069_v4 = vadd.f32 %v1585_v3, %v464_v1  ;;  %v1587_v5 = vpop.f32.mrb[1].mxu0  ;;  %v3529_v3 = vld [vmem:[#allocation5 + $0x1d4] ss:$8 sps:$4 sm:$0xff]  }
 0x1be   :  { %v3071_v10 = vadd.f32 %v1587_v5, %v468_v2  ;;  %v1589_v11 = vpop.f32.mrb[2].mxu0  ;;  %v3532_v5 = vld [vmem:[#allocation5 + $0x1e4] ss:$8 sps:$4 sm:$0xff]  }
 0x1bf   :  { %v3070_v14 = vadd.f32 %v3069_v4, %v3830_v32  ;;  %v3073_v15 = vadd.f32 %v1589_v11, %v464_v1  ;;  %v1591_v16 = vpop.f32.mrb[3].mxu0  ;;  %v3502_v32 = vld [vmem:[#allocation5 + $0x144] ss:$8 sps:$4 sm:$0xff]   ;;  %v3527_v4 = vld [vmem:[#allocation5 + $0x1d0] ss:$8 sps:$4 sm:$0xff]  }
 0x1c0   :  { %v3072_v6 = vadd.f32 %v3071_v10, %v3832_v33  ;;  %v3075_v7 = vadd.f32 %v1591_v16, %v468_v2  ;;  %v3526_v1 = vld [vmem:[#allocation5 + $0x1c4] ss:$8 sps:$4 sm:$0xff]   ;;  %v3524_v2 = vld [vmem:[#allocation5 + $0x1c0] ss:$8 sps:$4 sm:$0xff]   ;;  %v3535_v11 = vld [vmem:[#allocation5 + $0x1f4] ss:$8 sps:$4 sm:$0xff]  }
 0x1c1   :  { %v3074_v8 = vadd.f32 %v3073_v15, %v3834_v35  ;;  %v1809_v17 = vmax.f32 %v3070_v14, 0.0  ;;  %v3530_v10 = vld [vmem:[#allocation5 + $0x1e0] ss:$8 sps:$4 sm:$0xff]   ;;  %v3533_v14 = vld [vmem:[#allocation5 + $0x1f0] ss:$8 sps:$4 sm:$0xff]  }
 0x1c2   :  { %v3076_v12 = vadd.f32 %v3075_v7, %v3836_v38  ;;  %v1810_v19 = vmax.f32 %v3072_v6, 0.0  ;;  %v3547_v15 = vld [vmem:[%s3986_s5 + $0x28] sm:$0xff]   ;;  %v3548_v16 = vld [vmem:[%s3986_s5 + $0x70] sm:$0xff]   ;;  %v3550_v7 = vld [vmem:[%s3986_s5 + $0x78] sm:$0xff]  }
 0x1c3   :  { %v1813_v18 = vmax.f32 %v3074_v8, 0.0  ;;  %3012 = vmatpush3.bf16.msra.mxu1 %v3547_v15  ;;  %v3549_v6 = vld [vmem:[%s3986_s5 + $0x30] sm:$0xff]   ;;  %v3551_v8 = vld [vmem:[%s3986_s5 + $0x38] sm:$0xff]  }
 0x1c4   :  { %v1814_v20 = vmax.f32 %v3076_v12, 0.0  ;;  %3013 = vmatprep.subr.bf16.mxu1 %v3548_v16  ;;  %v3644_v12 = vmov 0.0  }
 0x1c5   :  { %v1817_v13 = vpack.c.bf16 %v1813_v18, %v1809_v17  ;;  %v1885_v17 = vld [vmem:[%s3985_s4] sm:$0x3] }
 0x1c6   :  { %v1818_v21 = vpack.c.bf16 %v1814_v20, %v1810_v19  ;;  %v1890_v18 = vrot.slane %v1885_v17, %v463_v61  ;;  %v1894_v19 = vrot.slane %v1885_v17, %v467_v63  ;;  %v3552_v61 = vld [vmem:[%s3988_s7] sm:$0xff]   ;;  %v3554_v63 = vld [vmem:[%s3988_s7 + $0x10] sm:$0xff]  }
 0x1c7   :  { %3014 = vmatpush3.bf16.msra.mxu1 %v3549_v6 }
 0x1c8   :  { %2249 = vmatprep.mubr.bf16.mxu0 %v1818_v21  ;;  %3015 = vmatprep.subr.bf16.mxu1 %v3550_v7 }
 0x1c9   :  { %2250 = vmatmul.mubr.bf16.vlgmr.msra.gmra.mrb[4].mxu0 %v1817_v13 }
 0x1ca   :  { %2261 = vmatpush1.bf16.msra.mxu0 %v3488_v22 }
 0x1cb   :  { %2262 = vmatprep.subr.bf16.mxu0 %v3493_v23  ;;  %3016 = vmatpush3.bf16.msra.mxu1 %v3551_v8 }
 0x1cc   :  { %3037 = vmatprep.subr.bf16.mxu1 %v3644_v12 }
 0x1ce   :  { %2263 = vmatpush1.bf16.msra.mxu0 %v3491_v24 }
 0x1cf   :  { %2264 = vmatprep.subr.bf16.mxu0 %v3496_v25 }
 0x1d2   :  { %2265 = vmatpush1.bf16.msra.mxu0 %v3494_v26 }
 0x1d3   :  { %2266 = vmatprep.subr.bf16.mxu0 %v3499_v28  ;;  %v1800_v33 = vpop.f32.mrb[4].mxu1 }
 0x1d4   :  { %v3077_v34 = vadd.f32 %v1800_v33, %v472_v30  ;;  %v1802_v35 = vpop.f32.mrb[5].mxu1  ;;  %v3556_v33 = vld [vmem:[%s3988_s7 + $0x20] sm:$0xff]  }
 0x1d5   :  { %v3078_v38 = vadd.f32 %v1802_v35, %v476_v0  ;;  %v1804_v29 = vpop.f32.mrb[6].mxu1  ;;  %v3558_v35 = vld [vmem:[%s3988_s7 + $0x30] sm:$0xff]  }
 0x1d6   :  { %2267 = vmatpush1.bf16.msra.mxu0 %v3497_v31  ;;  %v3079_v40 = vadd.f32 %v1804_v29, %v472_v30  ;;  %v1806_v41 = vpop.f32.mrb[7].mxu1  ;;  %v1811_v43 = vmax.f32 %v3077_v34, 0.0  ;;  %v3557_v34 = vld [vmem:[%s3988_s7 + $0x28] sm:$0xff]   ;;  %v2969_v29 = vld [vmem:[%s3987_s6] ss:$0 sm:$0xff] }
 0x1d7   :  { %2268 = vmatprep.subr.bf16.mxu0 %v3502_v32  ;;  %v3080_v42 = vadd.f32 %v1806_v41, %v476_v0  ;;  %v1812_v46 = vmax.f32 %v3078_v38, 0.0  ;;  %v3555_v32 = vld [vmem:[%s3988_s7 + $0x18] sm:$0xff]  }
 0x1d8   :  { %v1815_v44 = vmax.f32 %v3079_v40, 0.0 }
 0x1d9   :  { %v1816_v47 = vmax.f32 %v3080_v42, 0.0 }
 0x1da   :  { %2269 = vmatpush1.bf16.msra.mxu0 %v3500_v36  ;;  %v1819_v49 = vpack.c.bf16 %v1815_v44, %v1811_v43  ;;  %v3559_v36 = vld [vmem:[%s3988_s7 + $0x38] sm:$0xff]  }
 0x1db   :  { %2270 = vmatprep.subr.bf16.mxu0 %v3505_v39  ;;  %v1820_v50 = vpack.c.bf16 %v1816_v47, %v1812_v46 }
 0x1dd   :  { %2292 = vmatprep.mubr.bf16.mxu0 %v1820_v50  ;;  %v3561_v50 = vld [vmem:[%s3990_s9 + $0x8] sm:$0xff]  }
 0x1de   :  { %2271 = vmatpush1.bf16.msra.mxu0 %v3503_v45 }
 0x1df   :  { %2272 = vmatprep.subr.bf16.mxu0 %v3508_v48  ;;  %v3560_v48 = vld [vmem:[%s3990_s9] sm:$0xff]  }
 0x1e2   :  { %2273 = vmatpush1.bf16.msra.mxu0 %v3506_v51  ;;  %v3562_v51 = vld [vmem:[%s3990_s9 + $0x10] sm:$0xff]  }
 0x1e3   :  { %2274 = vmatprep.subr.bf16.mxu0 %v3511_v52  ;;  %v3563_v52 = vld [vmem:[%s3990_s9 + $0x18] sm:$0xff]  }
 0x1e6   :  { %2275 = vmatpush1.bf16.msra.mxu0 %v3509_v53  ;;  %v2986_v53 = vld [vmem:[%s3989_s8] ss:$0 sm:$0xff] }
 0x1e7   :  { %2276 = vmatprep.subr.bf16.mxu0 %v3514_v54 }
 0x1ea   :  { %2277 = vmatpush1.bf16.msra.mxu0 %v3512_v55 }
 0x1eb   :  { %2278 = vmatprep.subr.bf16.mxu0 %v3517_v56 }
 0x1ee   :  { %2279 = vmatpush1.bf16.msra.mxu0 %v3515_v57 }
 0x1ef   :  { %2280 = vmatprep.subr.bf16.mxu0 %v3520_v58 }
 0x1f2   :  { %2281 = vmatpush1.bf16.msra.mxu0 %v3518_v59 }
 0x1f3   :  { %2282 = vmatprep.subr.bf16.mxu0 %v3523_v60 }
 0x1f6   :  { %2283 = vmatpush1.bf16.msra.mxu0 %v3521_v62 }
 0x1f7   :  { %2284 = vmatprep.subr.bf16.mxu0 %v3526_v1 }
 0x1fa   :  { %2285 = vmatpush1.bf16.msra.mxu0 %v3524_v2  ;;  %v2995_v2 = vld [vmem:[%s3991_s10] ss:$0 sm:$0xff] }
 0x1fb   :  { %2286 = vmatprep.subr.bf16.mxu0 %v3529_v3 }
 0x1fe   :  { %2287 = vmatpush1.bf16.msra.mxu0 %v3527_v4 }
 0x1ff   :  { %2288 = vmatprep.subr.bf16.mxu0 %v3532_v5 }
 0x202   :  { %2289 = vmatpush1.bf16.msra.mxu0 %v3530_v10 }
 0x203   :  { %2290 = vmatprep.subr.bf16.mxu0 %v3535_v11 }
 0x206   :  { %2291 = vmatpush1.bf16.msra.mxu0 %v3533_v14 }
 0x209   :  { %2293 = vmatmul.mubr.bf16.vlgmr.msra.gmra.mrb[4].mxu0 %v1819_v49 }
 0x2dc   :  { %v2294_v20 = vpop.f32.mrb[4].mxu0 }
 0x2dd   :  { %v3081_v13 = vadd.f32 %v2294_v20, %v1890_v18  ;;  %v2296_v21 = vpop.f32.mrb[5].mxu0 }
 0x2de   :  { %v3082_v22 = vadd.f32 %v2296_v21, %v1894_v19  ;;  %v2298_v23 = vpop.f32.mrb[6].mxu0 }
 0x2df   :  { %v3083_v24 = vadd.f32 %v2298_v23, %v1890_v18  ;;  %v2300_v25 = vpop.f32.mrb[7].mxu0  ;;  %v2303_v26 = vmax.f32 %v3081_v13, 0.0 }
 0x2e0   :  { %v3084_v37 = vadd.f32 %v2300_v25, %v1894_v19  ;;  %v2304_v28 = vmax.f32 %v3082_v22, 0.0 }
 0x2e1   :  { %v2305_v27 = vmax.f32 %v3083_v24, 0.0 }
 0x2e2   :  { %v2306_v30 = vmax.f32 %v3084_v37, 0.0 }
 0x2e3   :  { %v2307_v31 = vpack.c.bf16 %v2305_v27, %v2303_v26 }
 0x2e4   :  { %v2308_v0 = vpack.c.bf16 %v2306_v30, %v2304_v28 }
 0x2e6   :  { %2476 = vmatprep.mubr.bf16.mxu1 %v2308_v0 }
 0x2e7   :  { %2477 = vmatmul.mubr.bf16.vlgmr.msra.gmra.mrb[8].mxu1 %v2307_v31 }
 0x2e8   :  { %3038 = vmatpush3.bf16.msra.mxu1 %v3552_v61  ;;  %3053 = vmatprep.mubr.msk.bf16.mxu1 %vm3645_vm1, %v3644_v12 }
 0x2e9   :  { %3039 = vmatprep.subr.bf16.mxu1 %v3644_v12 }
 0x2ec   :  { %3040 = vmatpush3.bf16.msra.mxu1 %v3553_v9 }
 0x2ed   :  { %3041 = vmatprep.subr.bf16.mxu1 %v3644_v12 }
 0x2f0   :  { %3042 = vmatpush3.bf16.msra.mxu1 %v3554_v63 }
 0x2f1   :  { %3043 = vmatprep.subr.bf16.mxu1 %v3644_v12 }
 0x2f4   :  { %3044 = vmatpush3.bf16.msra.mxu1 %v3555_v32 }
 0x2f5   :  { %3045 = vmatprep.subr.bf16.mxu1 %v3644_v12 }
 0x2f8   :  { %3046 = vmatpush3.bf16.msra.mxu1 %v3556_v33 }
 0x2f9   :  { %3047 = vmatprep.subr.bf16.mxu1 %v3644_v12 }
 0x2fc   :  { %3048 = vmatpush3.bf16.msra.mxu1 %v3557_v34 }
 0x2fd   :  { %3049 = vmatprep.subr.bf16.mxu1 %v3644_v12 }
 0x300   :  { %3050 = vmatpush3.bf16.msra.mxu1 %v3558_v35 }
 0x301   :  { %3051 = vmatprep.subr.bf16.mxu1 %v3644_v12 }
 0x304   :  { %3052 = vmatpush3.bf16.msra.mxu1 %v3559_v36 }
 0x305   :  { %3057 = vmatprep.subr.bf16.mxu1 %v3644_v12 }
 0x3ba   :  { %v3017_v38 = vpop.f32.mrb[8].mxu1 }
 0x3bb   :  { %v3018_v39 = vpop.f32.mrb[9].mxu1 }
 0x3bc   :  { %v3019_v40 = vadd.f32 %v3018_v39, %v3017_v38  ;;  %v3020_v41 = vpop.f32.mrb[10].mxu1 }
 0x3bd   :  { %v3021_v42 = vpop.f32.mrb[11].mxu1 }
 0x3be   :  { %v2479_v43 = vadd.f32 %v3019_v40, %v2969_v29  ;;  %v3022_v44 = vadd.f32 %v3021_v42, %v3020_v41 }
 0x3c0   :  { %v2482_v45 = vadd.f32 %v3022_v44, %v2969_v29  ;;  %v2485_v46 = vmax.f32 %v2479_v43, 0.0 }
 0x3c2   :  { %v2486_v47 = vmax.f32 %v2482_v45, 0.0 }
 0x3c4   :  { %v2487_v49 = vpack.c.bf16 %v2486_v47, %v2485_v46 }
 0x3c6   :  { %3054 = vmatmul.mubr.bf16.vlgmr.msra.gmra.mrb[12].mxu1 %v2487_v49 }
 0x3c7   :  { %3058 = vmatpush3.bf16.msra.mxu1 %v3560_v48  ;;  %3065 = vmatprep.mubr.msk.bf16.mxu1 %vm3645_vm1, %v3644_v12 }
 0x3c8   :  { %3059 = vmatprep.subr.bf16.mxu1 %v3644_v12 }
 0x3cb   :  { %3060 = vmatpush3.bf16.msra.mxu1 %v3561_v50 }
 0x3cc   :  { %3061 = vmatprep.subr.bf16.mxu1 %v3644_v12 }
 0x3cf   :  { %3062 = vmatpush3.bf16.msra.mxu1 %v3562_v51 }
 0x3d0   :  { %3063 = vmatprep.subr.bf16.mxu1 %v3644_v12 }
 0x3d3   :  { %3064 = vmatpush3.bf16.msra.mxu1 %v3563_v52 }
 0x499   :  { %v2593_v54 = vpop.f32.mrb[12].mxu1 }
 0x49a   :  { %v2594_v55 = vadd.f32 %v2986_v53, %v2593_v54  ;;  %v3055_v56 = vpop.f32.mrb[13].mxu1 }
 0x49b   :  { %v2596_v57 = vpop.f32.mrb[14].mxu1 }
 0x49c   :  { %v2597_v58 = vadd.f32 %v2986_v53, %v2596_v57  ;;  %v3056_v59 = vpop.f32.mrb[15].mxu1  ;;  %v2600_v60 = vmax.f32 %v2594_v55, 0.0 }
 0x49e   :  { %v2601_v62 = vmax.f32 %v2597_v58, 0.0 }
 0x4a0   :  { %v2602_v1 = vpack.c.bf16 %v2601_v62, %v2600_v60 }
 0x4a2   :  { %3066 = vmatmul.mubr.msk.bf16.vlgmr.msra.gmra.mrb[16].mxu1 %vm2642_vm2, %v2602_v1 }
 0x575   :  { %v2680_v3 = vpop.f32.mrb[16].mxu1 }
 0x576   :  { %v2681_v4 = vadd.f32 %v2995_v2, %v2680_v3  ;;  %v3067_v5 = vpop.f32.mrb[17].mxu1 }
 0x577   :  { %v2683_v10 = vpop.f32.mrb[18].mxu1 }
 0x578   :  { %2687 = vst [vmem:[#allocation7] sm:$0xff] %v2681_v4  ;;  %v2684_v11 = vadd.f32 %v2995_v2, %v2683_v10  ;;  %v3068_v14 = vpop.f32.mrb[19].mxu1 }
 0x57a   :  { %2688 = vst [vmem:[#allocation7 + $0x8] sm:$0xff] %v2684_v11 }
 0x57b   :  { %2693 = vsyncadd [#allocation4], 224  ;;  %s3646_s8 = smov [#allocation7]  }
 0x57c   :  { %s2694_s26 = sshll.u32 %s3646_s8, 4  ;;  %s2695_s26 = int_to_ptr.vmem [resolvable:$true] %s2694_s26 }
 0x57d   :  { %s3608_s27 = scalar_lea.vmem %s2695_s26, 32  ;;  %s3612_s28 = scalar_lea.vmem %s2695_s26, 256 }
 0x57e   :  { %p3609_p2 = scmp.ne.s32.totalorder %s2695_s26, %s3608_s27  ;;  %p3613_p3 = scmp.lt.s32.totalorder %s2695_s26, %s2695_s26 }
 0x57f   :  { %p3614_p4 = scmp.lt.s32.totalorder %s3612_s28, %s3608_s27 }
 0x581   :  { %p3615_p5 = por %p3614_p4, %p3613_p3 }
 0x583   :  { %p3616_p6 = pnand %p3615_p5, %p3609_p2 }
 0x585   :  { %3619 = shalt.err (!%p3616_p6)
}
 0x586   :  { %s3620_s30 = scalar_lea.hbm %s3992_s11, 32 }
 0x587   :  { %p3621_p7 = scmp.ne.s32.totalorder %s3992_s11, %s3620_s30  ;;  %p3624_p8 = scmp.lt.u32.totalorder %s3620_s30, %s3992_s11 }
 0x589   :  { %p3626_p9 = pnand %p3624_p8, %p3621_p7 }
 0x58b   :  { %3629 = shalt.err (!%p3626_p9)
}
 0x58c   :  { %s3647_s0 = smov 32   ;;  %s3648_s16 = smov 2  }
 0x58d   :  { %2700 = dma.vmem_to_hbm [thread:$0]  %s2695_s26, 32, %s3992_s11, [#allocation4], %s3647_s0, %s3647_s0, %s3648_s16  }
 0x58e   :  { %3634 = dma.done.wait [#allocation4], 256  }
 0x58f   :  { %3635 = vsyncadd [#allocation4], 4294967040 }
 0x590   :  { %2704 = vsyncpa [#allocation3], 1 }
 0x591   :  { %2705 = vsyncpa [#allocation6], 1 }
 0x592   :  { %2706 = vsyncpa [#allocation4], 1 }

</bundles_post_ra>
